<compile_context>
chip_gen: v6e
topology: v6e:2x2x1
jax: 0.10.0
libtpu: 0.0.40
codegen_flags: <defaults>
</compile_context>

<pallas_src>
import functools

import jax
import jax.numpy as jnp
import numpy as np
from jax.experimental import pallas as pl
from jax.experimental.pallas import tpu as pltpu


# ----------------------------------------------------------------------------
# Fused SEAN modulation kernel — one grid step per batch element.
#   segp  : (1, KK*L, P)      bf16  transposed im2col of padded segmap
#   x     : (1, C, P)         f32   noised input, channel-major (lane-dense)
#   wsst  : (1, HID+2C, KK*L) bf16  stacked [shared conv ; folded style convs] W
#   bsst  : (HID+2C, 1)       f32   stacked bias
#   wgm   : (KK, 2C, HID)     bf16  per-tap [gamma|mu] conv weights (transposed)
#   bgm   : (2C, 1)           f32   [gamma|mu] bias
#   alpha : (2C, 1)           f32   sigmoid blend coefficients (gamma rows, beta rows)
#   scale : (C, 1)            f32   1/sqrt(var+eps)
#   shift : (C, 1)            f32   -mean/sqrt(var+eps)
# Output: (1, C, P) f32 (channel-major; NCHW reshape in the wrapper is free).
# ----------------------------------------------------------------------------
def _sean_mod_kernel(segp_ref, x_ref, wsst_ref, bsst_ref, wgm_ref, bgm_ref,
                     alpha_ref, scale_ref, shift_ref, o_ref, *, H, W, KH, KW):
    C = x_ref.shape[1]
    HID = wgm_ref.shape[2]
    P = H * W
    ph, pw = KH // 2, KW // 2

    # ---- stacked first matmul: [shared segmap conv ; folded style convs].
    #      N = P lanes; f32 MXU accumulate; bias + ReLU stay f32.
    segp = segp_ref[0]                                          # (KK*L, P) bf16
    res = jnp.dot(wsst_ref[0], segp,
                  preferred_element_type=jnp.float32)           # (HID+2C, P)
    res = res + bsst_ref[...]
    actv = jnp.maximum(res[:HID, :], 0.0)                       # (HID, P)
    gm_st = res[HID:, :]                                        # (2C, P) [gamma_st ; beta_st]

    # ---- gamma/mu conv on actv: per-tap (2C,HID)x(HID,P) accumulation.
    #      Halo: flat lane zero pad of ph*W+pw each side; vertical OOB positions
    #      read zeros from the pad, horizontal OOB is masked on the (2C, P)
    #      per-tap contribution (equivalent to masking the input by linearity).
    actv_bf = actv.astype(jnp.bfloat16)
    pad = ph * W + pw
    zpad = jnp.zeros((HID, pad), jnp.bfloat16)
    actv_pad = jnp.concatenate([zpad, actv_bf, zpad], axis=1)   # (HID, P + 2*pad)

    xcol = jax.lax.broadcasted_iota(jnp.int32, (1, P), 1) % W   # pixel column index

    acc = jnp.zeros((2 * C, P), jnp.float32)
    for dy in range(KH):
        for dx in range(KW):
            k = dy * KW + dx
            off = dy * W + dx
            tap = actv_pad[:, off:off + P]                      # (HID, P) bf16
            contrib = jnp.dot(wgm_ref[k], tap,
                              preferred_element_type=jnp.float32)  # (2C, P)
            if dx != pw:
                valid = (xcol >= (pw - dx)) & (xcol < (W + pw - dx))
                contrib = jnp.where(valid, contrib, 0.0)
            acc = acc + contrib
    gm_seg = acc + bgm_ref[...]                                 # (2C, P) [gamma_seg ; beta_seg]

    # ---- sigmoid blend + batch-norm + modulation epilogue (lane-dense store).
    a = alpha_ref[...]                                          # (2C, 1)
    gm = a * gm_st + (1.0 - a) * gm_seg                         # (2C, P)
    gamma = gm[:C, :]
    beta = gm[C:, :]

    x = x_ref[0]                                                # (C, P)
    normalized = x * scale_ref[...] + shift_ref[...]            # BN(affine=False)
    o_ref[0] = ((1.0 + gamma) * normalized + beta).astype(o_ref.dtype)


def fused_sean_modulation(segp, noised_cm, wsst, bsst, wgm_taps, bgm, alpha,
                          bn_scale, bn_shift, *, H, W, KH, KW):
    B, C, P = noised_cm.shape
    KKL = segp.shape[1]
    M = wsst.shape[1]                     # HID + 2C
    KK = wgm_taps.shape[0]
    HID = wgm_taps.shape[2]
    kernel = functools.partial(_sean_mod_kernel, H=H, W=W, KH=KH, KW=KW)
    return pl.pallas_call(
        kernel,
        out_shape=jax.ShapeDtypeStruct((B, C, P), jnp.float32),
        grid=(B,),
        in_specs=[
            pl.BlockSpec((1, KKL, P), lambda b: (b, 0, 0)),       # segmap patches (bf16)
            pl.BlockSpec((1, C, P), lambda b: (b, 0, 0)),         # noised x, channel-major
            pl.BlockSpec((1, M, KKL), lambda b: (b, 0, 0)),       # stacked [shared;style] W
            pl.BlockSpec((M, 1), lambda b: (0, 0)),               # stacked bias
            pl.BlockSpec((KK, 2 * C, HID), lambda b: (0, 0, 0)),  # per-tap [gamma|mu] W
            pl.BlockSpec((2 * C, 1), lambda b: (0, 0)),           # [gamma|mu] bias
            pl.BlockSpec((2 * C, 1), lambda b: (0, 0)),           # blend alphas
            pl.BlockSpec((C, 1), lambda b: (0, 0)),               # BN scale
            pl.BlockSpec((C, 1), lambda b: (0, 0)),               # BN shift
        ],
        out_specs=pl.BlockSpec((1, C, P), lambda b: (b, 0, 0)),
        compiler_params=pltpu.CompilerParams(
            dimension_semantics=("parallel",),
            vmem_limit_bytes=32 * 1024 * 1024),
    )(segp, noised_cm, wsst, bsst, wgm_taps, bgm, alpha, bn_scale, bn_shift)


# ----------------------------------------------------------------------------
# Full SEANModulation forward (use_styles=True).
# ----------------------------------------------------------------------------
def sean_modulation_forward(p, x_nchw, seg_nchw, style_codes, noise_key, eps=1e-5):
    B, C, H, W = x_nchw.shape
    KH, KW, L, HID = p['w_shared'].shape
    ph, pw = KH // 2, KW // 2
    P = H * W

    # --- noise: (noise_var * randn(B, W, H, 1)).transpose(1, 3)   (plain-JAX glue)
    randn = jax.random.normal(noise_key, (B, W, H, 1), dtype=jnp.float32)
    noise_nchw = jnp.transpose(p['noise_var'] * randn, (0, 3, 2, 1))
    noised = x_nchw + noise_nchw
    noised_cm = noised.reshape(B, C, P)                          # channel-major, lane-dense

    # --- BatchNorm2d(affine=False) training-mode batch stats (2048 elems: plain JAX).
    mean = jnp.mean(noised, axis=(0, 2, 3))
    var = jnp.mean((noised - mean[None, :, None, None]) ** 2, axis=(0, 2, 3))
    bn_scale = (1.0 / jnp.sqrt(var + eps)).reshape(C, 1).astype(jnp.float32)
    bn_shift = (-mean).reshape(C, 1).astype(jnp.float32) * bn_scale

    # --- nearest segmap upsample to (H, W) + 'same' zero pad + transposed im2col.
    _, _, sh, sw = seg_nchw.shape
    ry = (jnp.arange(H) * sh) // H
    rx = (jnp.arange(W) * sw) // W
    seg_up = seg_nchw[:, :, ry][:, :, :, rx]                     # (B, L, H, W)
    seg_nhwc = jnp.transpose(seg_up, (0, 2, 3, 1))               # (B, H, W, L)
    seg_pad = jnp.pad(seg_nhwc, ((0, 0), (ph, ph), (pw, pw), (0, 0)))
    taps = [seg_pad[:, dy:dy + H, dx:dx + W, :]
            for dy in range(KH) for dx in range(KW)]             # each (B, H, W, L)
    segp = jnp.stack(taps, axis=1)                               # (B, KK, H, W, L)
    segp = jnp.transpose(segp, (0, 1, 4, 2, 3)).reshape(B, KH * KW * L, P)
    segp = segp.astype(jnp.bfloat16)                             # (B, KK*L, P)

    # --- per-label style projections folded into the st conv weights:
    #     conv(sum_i proj_i ⊗ seg_i, W) == conv(seg, fold_i(proj_i @ W)).
    proj = jax.nn.relu(jnp.einsum('bis,ist->bit', style_codes, p['st_w'])
                       + p['st_b'][None])                        # (B, L, S)
    w_eff_g = jnp.einsum('bis,hwsc->bhwic', proj, p['w_st_gamma'])  # (B,KH,KW,L,C)
    w_eff_b = jnp.einsum('bis,hwsc->bhwic', proj, p['w_st_beta'])
    w_eff = jnp.concatenate([w_eff_g, w_eff_b], axis=-1).reshape(B, KH * KW * L, 2 * C)

    # --- stacked first-matmul weight (HID+2C, KK*L) per batch, bf16.
    w_sh = jnp.broadcast_to(p['w_shared'].reshape(1, KH * KW * L, HID),
                            (B, KH * KW * L, HID))
    wsst = jnp.transpose(jnp.concatenate([w_sh, w_eff], axis=-1),
                         (0, 2, 1)).astype(jnp.bfloat16)         # (B, HID+2C, KK*L)
    bsst = jnp.concatenate([p['b_shared'], p['b_st_gamma'],
                            p['b_st_beta']]).reshape(HID + 2 * C, 1)

    # --- per-tap [gamma|mu] conv weights transposed to (2C, HID), bf16.
    wgm = jnp.concatenate([p['w_gamma'], p['w_mu']], axis=-1)    # (KH, KW, HID, 2C)
    wgm_taps = jnp.transpose(wgm.reshape(KH * KW, HID, 2 * C),
                             (0, 2, 1)).astype(jnp.bfloat16)     # (KK, 2C, HID)
    bgm = jnp.concatenate([p['b_gamma'], p['b_mu']]).reshape(2 * C, 1)

    # --- sigmoid blending coefficients, one per [gamma ; beta] output row.
    a_g = jax.nn.sigmoid(p['blending_gamma'][0])
    a_b = jax.nn.sigmoid(p['blending_beta'][0])
    alpha = jnp.concatenate([a_g * jnp.ones((C,), jnp.float32),
                             a_b * jnp.ones((C,), jnp.float32)]).reshape(2 * C, 1)

    out_cm = fused_sean_modulation(segp, noised_cm, wsst, bsst, wgm_taps, bgm,
                                   alpha, bn_scale, bn_shift,
                                   H=H, W=W, KH=KH, KW=KW)
    return out_cm.reshape(B, C, H, W)                            # already NCHW


# ----------------------------------------------------------------------------
# Pure-JAX reference (all f32) for the correctness check.
# ----------------------------------------------------------------------------
def reference_forward(p, x_nchw, seg_nchw, style_codes, noise_key, eps=1e-5):
    B, C, H, W = x_nchw.shape
    randn = jax.random.normal(noise_key, (B, W, H, 1), dtype=jnp.float32)
    noise = jnp.transpose(p['noise_var'] * randn, (0, 3, 2, 1))
    noised = x_nchw + noise
    mean = jnp.mean(noised, axis=(0, 2, 3), keepdims=True)
    var = jnp.mean((noised - mean) ** 2, axis=(0, 2, 3), keepdims=True)
    normalized = (noised - mean) / jnp.sqrt(var + eps)

    _, L, sh, sw = seg_nchw.shape
    ry = (jnp.arange(H) * sh) // H
    rx = (jnp.arange(W) * sw) // W
    seg_up = seg_nchw[:, :, ry][:, :, :, rx]                     # (B, L, H, W)

    S = style_codes.shape[-1]
    bc = jnp.zeros((B, S, H, W), jnp.float32)
    for i in range(L):
        proj = jax.nn.relu(style_codes[:, i, :] @ p['st_w'][i] + p['st_b'][i])
        bc = bc + proj[:, :, None, None] * seg_up[:, i:i + 1, :, :]

    def conv(xc, w, b):
        x_nhwc = jnp.transpose(xc, (0, 2, 3, 1))
        y = jax.lax.conv_general_dilated(
            x_nhwc, w, (1, 1), 'SAME',
            dimension_numbers=('NHWC', 'HWIO', 'NHWC')) + b
        return jnp.transpose(y, (0, 3, 1, 2))

    gamma_st = conv(bc, p['w_st_gamma'], p['b_st_gamma'])
    beta_st = conv(bc, p['w_st_beta'], p['b_st_beta'])
    actv = jax.nn.relu(conv(seg_up, p['w_shared'], p['b_shared']))
    gamma_seg = conv(actv, p['w_gamma'], p['b_gamma'])
    beta_seg = conv(actv, p['w_mu'], p['b_mu'])
    a_g = jax.nn.sigmoid(p['blending_gamma'][0])
    a_b = jax.nn.sigmoid(p['blending_beta'][0])
    gamma = a_g * gamma_st + (1 - a_g) * gamma_seg
    beta = a_b * beta_st + (1 - a_b) * beta_seg
    return (1 + gamma) * normalized + beta


if __name__ == "__main__":
    key = jax.random.PRNGKey(0)
    # batch=2, feature_map_dim=4, spatial=16x16, num_labels=4, style_dim=32,
    # kernel_size=3, hidden_dim=128 (fixed by the module), segmap 8x8.
    B, C, H, W = 2, 4, 16, 16
    L, S, K, HID = 4, 32, 3, 128

    ks = jax.random.split(key, 20)
    params = {
        'noise_var':      0.10 * jax.random.normal(ks[0], (C,), jnp.float32),
        'blending_gamma': 0.10 * jax.random.normal(ks[1], (1,), jnp.float32),
        'blending_beta':  0.10 * jax.random.normal(ks[2], (1,), jnp.float32),
        'w_shared':       0.10 * jax.random.normal(ks[3], (K, K, L, HID), jnp.float32),
        'b_shared':       0.10 * jax.random.normal(ks[4], (HID,), jnp.float32),
        'w_gamma':        0.05 * jax.random.normal(ks[5], (K, K, HID, C), jnp.float32),
        'b_gamma':        0.05 * jax.random.normal(ks[6], (C,), jnp.float32),
        'w_mu':           0.05 * jax.random.normal(ks[7], (K, K, HID, C), jnp.float32),
        'b_mu':           0.05 * jax.random.normal(ks[8], (C,), jnp.float32),
        'st_w':           0.10 * jax.random.normal(ks[9], (L, S, S), jnp.float32),
        'st_b':           0.10 * jax.random.normal(ks[10], (L, S), jnp.float32),
        'w_st_gamma':     0.05 * jax.random.normal(ks[11], (K, K, S, C), jnp.float32),
        'b_st_gamma':     0.05 * jax.random.normal(ks[12], (C,), jnp.float32),
        'w_st_beta':      0.05 * jax.random.normal(ks[13], (K, K, S, C), jnp.float32),
        'b_st_beta':      0.05 * jax.random.normal(ks[14], (C,), jnp.float32),
    }

    x = jax.random.normal(ks[15], (B, C, H, W), jnp.float32)
    seg = jax.nn.softmax(4.0 * jax.random.normal(ks[16], (B, L, 8, 8), jnp.float32), axis=1)
    style = jax.random.normal(ks[17], (B, L, S), jnp.float32)
    noise_key = ks[18]

    out = sean_modulation_forward(params, x, seg, style, noise_key)
    out = jax.block_until_ready(out)
    assert out.shape == (B, C, H, W)

    ref = reference_forward(params, x, seg, style, noise_key)
    # bf16 MXU operands (f32 accumulate) => a few 1e-3 absolute drift vs the
    # all-f32 reference; 2e-2 gives comfortable margin.
    np.testing.assert_allclose(np.asarray(out), np.asarray(ref), atol=2e-2, rtol=2e-2)

    print("KERNEL_OK")
</pallas_src>

<mosaic_0001>
module attributes {stable_mosaic.version = 11 : i64} {
  func.func @_sean_mod_kernel(%arg0: i32, %arg1: memref<1x36x256xbf16, #tpu.memory_space<vmem>>, %arg2: memref<1x4x256xf32, #tpu.memory_space<vmem>>, %arg3: memref<1x136x36xbf16, #tpu.memory_space<vmem>>, %arg4: memref<136x1xf32, #tpu.memory_space<vmem>>, %arg5: memref<9x8x128xbf16, #tpu.memory_space<vmem>>, %arg6: memref<8x1xf32, #tpu.memory_space<vmem>>, %arg7: memref<8x1xf32, #tpu.memory_space<vmem>>, %arg8: memref<4x1xf32, #tpu.memory_space<vmem>>, %arg9: memref<4x1xf32, #tpu.memory_space<vmem>>, %arg10: memref<1x4x256xf32, #tpu.memory_space<vmem>>) attributes {dimension_semantics = [#tpu.dimension_semantics<parallel>], iteration_bounds = array<i64: 2>, scalar_prefetch = 0 : i64, scratch_operands = 0 : i64, tpu.core_type = #tpu.core_type<tc>, window_params = [{transform_indices = @transform_0, window_bounds = array<i64: 1, 36, 256>}, {transform_indices = @transform_1, window_bounds = array<i64: 1, 4, 256>}, {transform_indices = @transform_2, window_bounds = array<i64: 1, 136, 36>}, {pipeline_mode = #tpu.pipeline_mode<synchronous>, transform_indices = @transform_3, window_bounds = array<i64: 136, 1>}, {pipeline_mode = #tpu.pipeline_mode<synchronous>, transform_indices = @transform_4, window_bounds = array<i64: 9, 8, 128>}, {pipeline_mode = #tpu.pipeline_mode<synchronous>, transform_indices = @transform_5, window_bounds = array<i64: 8, 1>}, {pipeline_mode = #tpu.pipeline_mode<synchronous>, transform_indices = @transform_6, window_bounds = array<i64: 8, 1>}, {pipeline_mode = #tpu.pipeline_mode<synchronous>, transform_indices = @transform_7, window_bounds = array<i64: 4, 1>}, {pipeline_mode = #tpu.pipeline_mode<synchronous>, transform_indices = @transform_8, window_bounds = array<i64: 4, 1>}, {transform_indices = @transform_9, window_bounds = array<i64: 1, 4, 256>}]} {
    %c0 = arith.constant 0 : index
    %c0_0 = arith.constant 0 : index
    %c0_1 = arith.constant 0 : index
    %0 = vector.load %arg1[%c0, %c0_0, %c0_1] : memref<1x36x256xbf16, #tpu.memory_space<vmem>>, vector<1x36x256xbf16>
    %1 = vector.shape_cast %0 : vector<1x36x256xbf16> to vector<36x256xbf16>
    %c0_2 = arith.constant 0 : index
    %c0_3 = arith.constant 0 : index
    %c0_4 = arith.constant 0 : index
    %2 = vector.load %arg3[%c0_2, %c0_3, %c0_4] : memref<1x136x36xbf16, #tpu.memory_space<vmem>>, vector<1x136x36xbf16>
    %3 = vector.shape_cast %2 : vector<1x136x36xbf16> to vector<136x36xbf16>
    %cst = arith.constant dense<0.000000e+00> : vector<136x256xf32>
    %4 = tpu.matmul %3, %1, %cst {dimension_numbers = #tpu.dot_dimension_numbers<[1], [0], [0], [1], [0, 0, 1, 1], [], []>} : vector<136x36xbf16>, vector<36x256xbf16>, vector<136x256xf32> -> vector<136x256xf32>
    %c0_5 = arith.constant 0 : index
    %c0_6 = arith.constant 0 : index
    %5 = vector.load %arg4[%c0_5, %c0_6] : memref<136x1xf32, #tpu.memory_space<vmem>>, vector<136x1xf32>
    %6 = vector.broadcast %5 : vector<136x1xf32> to vector<136x256xf32>
    %7 = arith.addf %4, %6 : vector<136x256xf32>
    %8 = vector.extract_strided_slice %7 {offsets = [0, 0], sizes = [128, 256], strides = [1, 1]} : vector<136x256xf32> to vector<128x256xf32>
    %cst_7 = arith.constant 0.000000e+00 : f32
    %9 = vector.broadcast %cst_7 : f32 to vector<128x256xf32>
    %10 = arith.maximumf %8, %9 : vector<128x256xf32>
    %11 = vector.extract_strided_slice %7 {offsets = [128, 0], sizes = [8, 256], strides = [1, 1]} : vector<136x256xf32> to vector<8x256xf32>
    %12 = arith.truncf %10 : vector<128x256xf32> to vector<128x256xbf16>
    %cst_8 = arith.constant 0.000000e+00 : bf16
    %13 = vector.broadcast %cst_8 : bf16 to vector<128x17xbf16>
    %14 = tpu.concatenate %13, %12, %13 in 1 : vector<128x17xbf16>, vector<128x256xbf16>, vector<128x17xbf16> -> vector<128x290xbf16>
    %15 = tpu.iota {dimensions = array<i32: 1>} : vector<1x256xi32>
    %c16_i32 = arith.constant 16 : i32
    %c0_i32 = arith.constant 0 : i32
    %16 = arith.cmpi eq, %c16_i32, %c0_i32 : i32
    %c1_i32 = arith.constant 1 : i32
    %17 = arith.select %16, %c1_i32, %c16_i32 : i32
    %18 = vector.broadcast %17 : i32 to vector<1x256xi32>
    %19 = arith.remsi %15, %18 : vector<1x256xi32>
    %c0_i32_9 = arith.constant 0 : i32
    %20 = vector.broadcast %c0_i32_9 : i32 to vector<1x256xi32>
    %21 = arith.cmpi ne, %19, %20 : vector<1x256xi32>
    %c0_i32_10 = arith.constant 0 : i32
    %22 = vector.broadcast %c0_i32_10 : i32 to vector<1x256xi32>
    %23 = arith.cmpi slt, %19, %22 : vector<1x256xi32>
    %c0_i32_11 = arith.constant 0 : i32
    %24 = arith.cmpi slt, %17, %c0_i32_11 : i32
    %25 = vector.broadcast %24 : i1 to vector<1x256xi1>
    %26 = vector.broadcast %25 : vector<1x256xi1> to vector<1x256xi1>
    %27 = arith.xori %23, %26 : vector<1x256xi1>
    %28 = arith.andi %27, %21 : vector<1x256xi1>
    %29 = vector.broadcast %17 : i32 to vector<1x256xi32>
    %30 = arith.addi %19, %29 : vector<1x256xi32>
    %31 = arith.select %28, %30, %19 : vector<1x256xi1>, vector<1x256xi32>
    %cst_12 = arith.constant 0.000000e+00 : f32
    %32 = vector.broadcast %cst_12 : f32 to vector<8x256xf32>
    %33 = vector.extract_strided_slice %14 {offsets = [0, 0], sizes = [128, 256], strides = [1, 1]} : vector<128x290xbf16> to vector<128x256xbf16>
    %c0_13 = arith.constant 0 : index
    %c0_14 = arith.constant 0 : index
    %c0_15 = arith.constant 0 : index
    %34 = vector.load %arg5[%c0_13, %c0_14, %c0_15] : memref<9x8x128xbf16, #tpu.memory_space<vmem>>, vector<1x8x128xbf16>
    %35 = vector.shape_cast %34 : vector<1x8x128xbf16> to vector<8x128xbf16>
    %cst_16 = arith.constant dense<0.000000e+00> : vector<8x256xf32>
    %36 = tpu.matmul %35, %33, %cst_16 {dimension_numbers = #tpu.dot_dimension_numbers<[1], [0], [0], [1], [0, 0, 1, 1], [], []>} : vector<8x128xbf16>, vector<128x256xbf16>, vector<8x256xf32> -> vector<8x256xf32>
    %c1_i32_17 = arith.constant 1 : i32
    %37 = vector.broadcast %c1_i32_17 : i32 to vector<1x256xi32>
    %38 = arith.cmpi sge, %31, %37 : vector<1x256xi32>
    %c17_i32 = arith.constant 17 : i32
    %39 = vector.broadcast %c17_i32 : i32 to vector<1x256xi32>
    %40 = arith.cmpi slt, %31, %39 : vector<1x256xi32>
    %41 = arith.andi %38, %40 : vector<1x256xi1>
    %cst_18 = arith.constant 0.000000e+00 : f32
    %42 = vector.shape_cast %41 : vector<1x256xi1> to vector<1x256xi1>
    %43 = vector.broadcast %42 : vector<1x256xi1> to vector<8x256xi1>
    %44 = vector.broadcast %cst_18 : f32 to vector<8x256xf32>
    %45 = arith.select %43, %36, %44 : vector<8x256xi1>, vector<8x256xf32>
    %46 = arith.addf %32, %45 : vector<8x256xf32>
    %47 = vector.extract_strided_slice %14 {offsets = [0, 1], sizes = [128, 256], strides = [1, 1]} : vector<128x290xbf16> to vector<128x256xbf16>
    %c1 = arith.constant 1 : index
    %c0_19 = arith.constant 0 : index
    %c0_20 = arith.constant 0 : index
    %48 = vector.load %arg5[%c1, %c0_19, %c0_20] : memref<9x8x128xbf16, #tpu.memory_space<vmem>>, vector<1x8x128xbf16>
    %49 = vector.shape_cast %48 : vector<1x8x128xbf16> to vector<8x128xbf16>
    %cst_21 = arith.constant dense<0.000000e+00> : vector<8x256xf32>
    %50 = tpu.matmul %49, %47, %cst_21 {dimension_numbers = #tpu.dot_dimension_numbers<[1], [0], [0], [1], [0, 0, 1, 1], [], []>} : vector<8x128xbf16>, vector<128x256xbf16>, vector<8x256xf32> -> vector<8x256xf32>
    %51 = arith.addf %46, %50 : vector<8x256xf32>
    %52 = vector.extract_strided_slice %14 {offsets = [0, 2], sizes = [128, 256], strides = [1, 1]} : vector<128x290xbf16> to vector<128x256xbf16>
    %c2 = arith.constant 2 : index
    %c0_22 = arith.constant 0 : index
    %c0_23 = arith.constant 0 : index
    %53 = vector.load %arg5[%c2, %c0_22, %c0_23] : memref<9x8x128xbf16, #tpu.memory_space<vmem>>, vector<1x8x128xbf16>
    %54 = vector.shape_cast %53 : vector<1x8x128xbf16> to vector<8x128xbf16>
    %cst_24 = arith.constant dense<0.000000e+00> : vector<8x256xf32>
    %55 = tpu.matmul %54, %52, %cst_24 {dimension_numbers = #tpu.dot_dimension_numbers<[1], [0], [0], [1], [0, 0, 1, 1], [], []>} : vector<8x128xbf16>, vector<128x256xbf16>, vector<8x256xf32> -> vector<8x256xf32>
    %c-1_i32 = arith.constant -1 : i32
    %56 = vector.broadcast %c-1_i32 : i32 to vector<1x256xi32>
    %57 = arith.cmpi sge, %31, %56 : vector<1x256xi32>
    %c15_i32 = arith.constant 15 : i32
    %58 = vector.broadcast %c15_i32 : i32 to vector<1x256xi32>
    %59 = arith.cmpi slt, %31, %58 : vector<1x256xi32>
    %60 = arith.andi %57, %59 : vector<1x256xi1>
    %cst_25 = arith.constant 0.000000e+00 : f32
    %61 = vector.shape_cast %60 : vector<1x256xi1> to vector<1x256xi1>
    %62 = vector.broadcast %61 : vector<1x256xi1> to vector<8x256xi1>
    %63 = vector.broadcast %cst_25 : f32 to vector<8x256xf32>
    %64 = arith.select %62, %55, %63 : vector<8x256xi1>, vector<8x256xf32>
    %65 = arith.addf %51, %64 : vector<8x256xf32>
    %66 = vector.extract_strided_slice %14 {offsets = [0, 16], sizes = [128, 256], strides = [1, 1]} : vector<128x290xbf16> to vector<128x256xbf16>
    %c3 = arith.constant 3 : index
    %c0_26 = arith.constant 0 : index
    %c0_27 = arith.constant 0 : index
    %67 = vector.load %arg5[%c3, %c0_26, %c0_27] : memref<9x8x128xbf16, #tpu.memory_space<vmem>>, vector<1x8x128xbf16>
    %68 = vector.shape_cast %67 : vector<1x8x128xbf16> to vector<8x128xbf16>
    %cst_28 = arith.constant dense<0.000000e+00> : vector<8x256xf32>
    %69 = tpu.matmul %68, %66, %cst_28 {dimension_numbers = #tpu.dot_dimension_numbers<[1], [0], [0], [1], [0, 0, 1, 1], [], []>} : vector<8x128xbf16>, vector<128x256xbf16>, vector<8x256xf32> -> vector<8x256xf32>
    %c1_i32_29 = arith.constant 1 : i32
    %70 = vector.broadcast %c1_i32_29 : i32 to vector<1x256xi32>
    %71 = arith.cmpi sge, %31, %70 : vector<1x256xi32>
    %c17_i32_30 = arith.constant 17 : i32
    %72 = vector.broadcast %c17_i32_30 : i32 to vector<1x256xi32>
    %73 = arith.cmpi slt, %31, %72 : vector<1x256xi32>
    %74 = arith.andi %71, %73 : vector<1x256xi1>
    %cst_31 = arith.constant 0.000000e+00 : f32
    %75 = vector.shape_cast %74 : vector<1x256xi1> to vector<1x256xi1>
    %76 = vector.broadcast %75 : vector<1x256xi1> to vector<8x256xi1>
    %77 = vector.broadcast %cst_31 : f32 to vector<8x256xf32>
    %78 = arith.select %76, %69, %77 : vector<8x256xi1>, vector<8x256xf32>
    %79 = arith.addf %65, %78 : vector<8x256xf32>
    %80 = vector.extract_strided_slice %14 {offsets = [0, 17], sizes = [128, 256], strides = [1, 1]} : vector<128x290xbf16> to vector<128x256xbf16>
    %c4 = arith.constant 4 : index
    %c0_32 = arith.constant 0 : index
    %c0_33 = arith.constant 0 : index
    %81 = vector.load %arg5[%c4, %c0_32, %c0_33] : memref<9x8x128xbf16, #tpu.memory_space<vmem>>, vector<1x8x128xbf16>
    %82 = vector.shape_cast %81 : vector<1x8x128xbf16> to vector<8x128xbf16>
    %cst_34 = arith.constant dense<0.000000e+00> : vector<8x256xf32>
    %83 = tpu.matmul %82, %80, %cst_34 {dimension_numbers = #tpu.dot_dimension_numbers<[1], [0], [0], [1], [0, 0, 1, 1], [], []>} : vector<8x128xbf16>, vector<128x256xbf16>, vector<8x256xf32> -> vector<8x256xf32>
    %84 = arith.addf %79, %83 : vector<8x256xf32>
    %85 = vector.extract_strided_slice %14 {offsets = [0, 18], sizes = [128, 256], strides = [1, 1]} : vector<128x290xbf16> to vector<128x256xbf16>
    %c5 = arith.constant 5 : index
    %c0_35 = arith.constant 0 : index
    %c0_36 = arith.constant 0 : index
    %86 = vector.load %arg5[%c5, %c0_35, %c0_36] : memref<9x8x128xbf16, #tpu.memory_space<vmem>>, vector<1x8x128xbf16>
    %87 = vector.shape_cast %86 : vector<1x8x128xbf16> to vector<8x128xbf16>
    %cst_37 = arith.constant dense<0.000000e+00> : vector<8x256xf32>
    %88 = tpu.matmul %87, %85, %cst_37 {dimension_numbers = #tpu.dot_dimension_numbers<[1], [0], [0], [1], [0, 0, 1, 1], [], []>} : vector<8x128xbf16>, vector<128x256xbf16>, vector<8x256xf32> -> vector<8x256xf32>
    %c-1_i32_38 = arith.constant -1 : i32
    %89 = vector.broadcast %c-1_i32_38 : i32 to vector<1x256xi32>
    %90 = arith.cmpi sge, %31, %89 : vector<1x256xi32>
    %c15_i32_39 = arith.constant 15 : i32
    %91 = vector.broadcast %c15_i32_39 : i32 to vector<1x256xi32>
    %92 = arith.cmpi slt, %31, %91 : vector<1x256xi32>
    %93 = arith.andi %90, %92 : vector<1x256xi1>
    %cst_40 = arith.constant 0.000000e+00 : f32
    %94 = vector.shape_cast %93 : vector<1x256xi1> to vector<1x256xi1>
    %95 = vector.broadcast %94 : vector<1x256xi1> to vector<8x256xi1>
    %96 = vector.broadcast %cst_40 : f32 to vector<8x256xf32>
    %97 = arith.select %95, %88, %96 : vector<8x256xi1>, vector<8x256xf32>
    %98 = arith.addf %84, %97 : vector<8x256xf32>
    %99 = vector.extract_strided_slice %14 {offsets = [0, 32], sizes = [128, 256], strides = [1, 1]} : vector<128x290xbf16> to vector<128x256xbf16>
    %c6 = arith.constant 6 : index
    %c0_41 = arith.constant 0 : index
    %c0_42 = arith.constant 0 : index
    %100 = vector.load %arg5[%c6, %c0_41, %c0_42] : memref<9x8x128xbf16, #tpu.memory_space<vmem>>, vector<1x8x128xbf16>
    %101 = vector.shape_cast %100 : vector<1x8x128xbf16> to vector<8x128xbf16>
    %cst_43 = arith.constant dense<0.000000e+00> : vector<8x256xf32>
    %102 = tpu.matmul %101, %99, %cst_43 {dimension_numbers = #tpu.dot_dimension_numbers<[1], [0], [0], [1], [0, 0, 1, 1], [], []>} : vector<8x128xbf16>, vector<128x256xbf16>, vector<8x256xf32> -> vector<8x256xf32>
    %c1_i32_44 = arith.constant 1 : i32
    %103 = vector.broadcast %c1_i32_44 : i32 to vector<1x256xi32>
    %104 = arith.cmpi sge, %31, %103 : vector<1x256xi32>
    %c17_i32_45 = arith.constant 17 : i32
    %105 = vector.broadcast %c17_i32_45 : i32 to vector<1x256xi32>
    %106 = arith.cmpi slt, %31, %105 : vector<1x256xi32>
    %107 = arith.andi %104, %106 : vector<1x256xi1>
    %cst_46 = arith.constant 0.000000e+00 : f32
    %108 = vector.shape_cast %107 : vector<1x256xi1> to vector<1x256xi1>
    %109 = vector.broadcast %108 : vector<1x256xi1> to vector<8x256xi1>
    %110 = vector.broadcast %cst_46 : f32 to vector<8x256xf32>
    %111 = arith.select %109, %102, %110 : vector<8x256xi1>, vector<8x256xf32>
    %112 = arith.addf %98, %111 : vector<8x256xf32>
    %113 = vector.extract_strided_slice %14 {offsets = [0, 33], sizes = [128, 256], strides = [1, 1]} : vector<128x290xbf16> to vector<128x256xbf16>
    %c7 = arith.constant 7 : index
    %c0_47 = arith.constant 0 : index
    %c0_48 = arith.constant 0 : index
    %114 = vector.load %arg5[%c7, %c0_47, %c0_48] : memref<9x8x128xbf16, #tpu.memory_space<vmem>>, vector<1x8x128xbf16>
    %115 = vector.shape_cast %114 : vector<1x8x128xbf16> to vector<8x128xbf16>
    %cst_49 = arith.constant dense<0.000000e+00> : vector<8x256xf32>
    %116 = tpu.matmul %115, %113, %cst_49 {dimension_numbers = #tpu.dot_dimension_numbers<[1], [0], [0], [1], [0, 0, 1, 1], [], []>} : vector<8x128xbf16>, vector<128x256xbf16>, vector<8x256xf32> -> vector<8x256xf32>
    %117 = arith.addf %112, %116 : vector<8x256xf32>
    %118 = vector.extract_strided_slice %14 {offsets = [0, 34], sizes = [128, 256], strides = [1, 1]} : vector<128x290xbf16> to vector<128x256xbf16>
    %c8 = arith.constant 8 : index
    %c0_50 = arith.constant 0 : index
    %c0_51 = arith.constant 0 : index
    %119 = vector.load %arg5[%c8, %c0_50, %c0_51] : memref<9x8x128xbf16, #tpu.memory_space<vmem>>, vector<1x8x128xbf16>
    %120 = vector.shape_cast %119 : vector<1x8x128xbf16> to vector<8x128xbf16>
    %cst_52 = arith.constant dense<0.000000e+00> : vector<8x256xf32>
    %121 = tpu.matmul %120, %118, %cst_52 {dimension_numbers = #tpu.dot_dimension_numbers<[1], [0], [0], [1], [0, 0, 1, 1], [], []>} : vector<8x128xbf16>, vector<128x256xbf16>, vector<8x256xf32> -> vector<8x256xf32>
    %c-1_i32_53 = arith.constant -1 : i32
    %122 = vector.broadcast %c-1_i32_53 : i32 to vector<1x256xi32>
    %123 = arith.cmpi sge, %31, %122 : vector<1x256xi32>
    %c15_i32_54 = arith.constant 15 : i32
    %124 = vector.broadcast %c15_i32_54 : i32 to vector<1x256xi32>
    %125 = arith.cmpi slt, %31, %124 : vector<1x256xi32>
    %126 = arith.andi %123, %125 : vector<1x256xi1>
    %cst_55 = arith.constant 0.000000e+00 : f32
    %127 = vector.shape_cast %126 : vector<1x256xi1> to vector<1x256xi1>
    %128 = vector.broadcast %127 : vector<1x256xi1> to vector<8x256xi1>
    %129 = vector.broadcast %cst_55 : f32 to vector<8x256xf32>
    %130 = arith.select %128, %121, %129 : vector<8x256xi1>, vector<8x256xf32>
    %131 = arith.addf %117, %130 : vector<8x256xf32>
    %c0_56 = arith.constant 0 : index
    %c0_57 = arith.constant 0 : index
    %132 = vector.load %arg6[%c0_56, %c0_57] : memref<8x1xf32, #tpu.memory_space<vmem>>, vector<8x1xf32>
    %133 = vector.broadcast %132 : vector<8x1xf32> to vector<8x256xf32>
    %134 = arith.addf %131, %133 : vector<8x256xf32>
    %c0_58 = arith.constant 0 : index
    %c0_59 = arith.constant 0 : index
    %135 = vector.load %arg7[%c0_58, %c0_59] : memref<8x1xf32, #tpu.memory_space<vmem>>, vector<8x1xf32>
    %136 = vector.broadcast %135 : vector<8x1xf32> to vector<8x256xf32>
    %137 = arith.mulf %136, %11 : vector<8x256xf32>
    %cst_60 = arith.constant 1.000000e+00 : f32
    %138 = vector.broadcast %cst_60 : f32 to vector<8x1xf32>
    %139 = arith.subf %138, %135 : vector<8x1xf32>
    %140 = vector.broadcast %139 : vector<8x1xf32> to vector<8x256xf32>
    %141 = arith.mulf %140, %134 : vector<8x256xf32>
    %142 = arith.addf %137, %141 : vector<8x256xf32>
    %143 = vector.extract_strided_slice %142 {offsets = [0, 0], sizes = [4, 256], strides = [1, 1]} : vector<8x256xf32> to vector<4x256xf32>
    %144 = vector.extract_strided_slice %142 {offsets = [4, 0], sizes = [4, 256], strides = [1, 1]} : vector<8x256xf32> to vector<4x256xf32>
    %c0_61 = arith.constant 0 : index
    %c0_62 = arith.constant 0 : index
    %c0_63 = arith.constant 0 : index
    %145 = vector.load %arg2[%c0_61, %c0_62, %c0_63] : memref<1x4x256xf32, #tpu.memory_space<vmem>>, vector<1x4x256xf32>
    %146 = vector.shape_cast %145 : vector<1x4x256xf32> to vector<4x256xf32>
    %c0_64 = arith.constant 0 : index
    %c0_65 = arith.constant 0 : index
    %147 = vector.load %arg8[%c0_64, %c0_65] : memref<4x1xf32, #tpu.memory_space<vmem>>, vector<4x1xf32>
    %148 = vector.broadcast %147 : vector<4x1xf32> to vector<4x256xf32>
    %149 = arith.mulf %146, %148 : vector<4x256xf32>
    %c0_66 = arith.constant 0 : index
    %c0_67 = arith.constant 0 : index
    %150 = vector.load %arg9[%c0_66, %c0_67] : memref<4x1xf32, #tpu.memory_space<vmem>>, vector<4x1xf32>
    %151 = vector.broadcast %150 : vector<4x1xf32> to vector<4x256xf32>
    %152 = arith.addf %149, %151 : vector<4x256xf32>
    %cst_68 = arith.constant 1.000000e+00 : f32
    %153 = vector.broadcast %cst_68 : f32 to vector<4x256xf32>
    %154 = arith.addf %153, %143 : vector<4x256xf32>
    %155 = arith.mulf %154, %152 : vector<4x256xf32>
    %156 = arith.addf %155, %144 : vector<4x256xf32>
    %c0_69 = arith.constant 0 : index
    %c0_70 = arith.constant 0 : index
    %c0_71 = arith.constant 0 : index
    %157 = vector.load %arg10[%c0_69, %c0_70, %c0_71] : memref<1x4x256xf32, #tpu.memory_space<vmem>>, vector<1x4x256xf32>
    %158 = vector.shape_cast %157 : vector<1x4x256xf32> to vector<4x256xf32>
    %159 = vector.shape_cast %156 : vector<4x256xf32> to vector<1x4x256xf32>
    tpu.vector_store %arg10[%c0_69, %c0_70, %c0_71], %159 {strides = array<i32>} : memref<1x4x256xf32, #tpu.memory_space<vmem>>, vector<1x4x256xf32>,
    return
  }
  func.func @transform_0(%arg0: i32) -> (i32, i32, i32) {
    %c0_i32 = arith.constant 0 : i32
    %c0_i32_0 = arith.constant 0 : i32
    %c0_i32_1 = arith.constant 0 : i32
    return %arg0, %c0_i32, %c0_i32_0 : i32, i32, i32
  }
  func.func @transform_1(%arg0: i32) -> (i32, i32, i32) {
    %c0_i32 = arith.constant 0 : i32
    %c0_i32_0 = arith.constant 0 : i32
    %c0_i32_1 = arith.constant 0 : i32
    return %arg0, %c0_i32, %c0_i32_0 : i32, i32, i32
  }
  func.func @transform_2(%arg0: i32) -> (i32, i32, i32) {
    %c0_i32 = arith.constant 0 : i32
    %c0_i32_0 = arith.constant 0 : i32
    %c0_i32_1 = arith.constant 0 : i32
    return %arg0, %c0_i32, %c0_i32_0 : i32, i32, i32
  }
  func.func @transform_3(%arg0: i32) -> (i32, i32) {
    %c0_i32 = arith.constant 0 : i32
    %c0_i32_0 = arith.constant 0 : i32
    %c0_i32_1 = arith.constant 0 : i32
    return %c0_i32, %c0_i32_0 : i32, i32
  }
  func.func @transform_4(%arg0: i32) -> (i32, i32, i32) {
    %c0_i32 = arith.constant 0 : i32
    %c0_i32_0 = arith.constant 0 : i32
    %c0_i32_1 = arith.constant 0 : i32
    %c0_i32_2 = arith.constant 0 : i32
    return %c0_i32, %c0_i32_0, %c0_i32_1 : i32, i32, i32
  }
  func.func @transform_5(%arg0: i32) -> (i32, i32) {
    %c0_i32 = arith.constant 0 : i32
    %c0_i32_0 = arith.constant 0 : i32
    %c0_i32_1 = arith.constant 0 : i32
    return %c0_i32, %c0_i32_0 : i32, i32
  }
  func.func @transform_6(%arg0: i32) -> (i32, i32) {
    %c0_i32 = arith.constant 0 : i32
    %c0_i32_0 = arith.constant 0 : i32
    %c0_i32_1 = arith.constant 0 : i32
    return %c0_i32, %c0_i32_0 : i32, i32
  }
  func.func @transform_7(%arg0: i32) -> (i32, i32) {
    %c0_i32 = arith.constant 0 : i32
    %c0_i32_0 = arith.constant 0 : i32
    %c0_i32_1 = arith.constant 0 : i32
    return %c0_i32, %c0_i32_0 : i32, i32
  }
  func.func @transform_8(%arg0: i32) -> (i32, i32) {
    %c0_i32 = arith.constant 0 : i32
    %c0_i32_0 = arith.constant 0 : i32
    %c0_i32_1 = arith.constant 0 : i32
    return %c0_i32, %c0_i32_0 : i32, i32
  }
  func.func @transform_9(%arg0: i32) -> (i32, i32, i32) {
    %c0_i32 = arith.constant 0 : i32
    %c0_i32_0 = arith.constant 0 : i32
    %c0_i32_1 = arith.constant 0 : i32
    return %arg0, %c0_i32, %c0_i32_0 : i32, i32, i32
  }
}

</mosaic_0001>

<bundles_post_ra>
// kernel: tpu_custom_call.1
= control target key start
LH: loop header
LB: loop body
LE: loop exit
PB: predicated region body
PF: predicated region fallthrough
CT: control target
= control target key end

     0   :  { %14 = vsyncpa [#allocation3], 0  ;;  %s3920_s0 = inlined_call_operand.vmem [shape: bf16[2,36,256], index: 0, kind: input, shape index: {}]   ;;  %s3921_s1 = inlined_call_operand.vmem [shape: f32[2,4,256], index: 1, kind: input, shape index: {}]   ;;  %s3922_s2 = inlined_call_operand.vmem [shape: bf16[2,136,36], index: 2, kind: input, shape index: {}]   ;;  %s3923_s3 = inlined_call_operand.vmem [shape: f32[136,1], index: 3, kind: input, shape index: {}]   ;;  %s3924_s4 = inlined_call_operand.vmem [shape: bf16[9,8,128], index: 4, kind: input, shape index: {}]   ;;  %s3925_s5 = inlined_call_operand.vmem [shape: f32[8,1], index: 5, kind: input, shape index: {}]   ;;  %s3926_s6 = inlined_call_operand.vmem [shape: f32[8,1], index: 6, kind: input, shape index: {}]   ;;  %s3927_s7 = inlined_call_operand.vmem [shape: f32[4,1], index: 7, kind: input, shape index: {}]   ;;  %s3928_s8 = inlined_call_operand.vmem [shape: f32[4,1], index: 8, kind: input, shape index: {}]   ;;  %s3929_s9 = inlined_call_operand.hbm [shape: f32[2,4,256], index: 9, kind: output, shape index: {}]  }
   0x1   :  { %16 = vsyncpa [#allocation3 + $0x1], 0  ;;  %s2435_s30 = smov 0   ;;  %s2437_s10 = smov 0  }
   0x2   :  { %s2439_s11 = smov 0   ;;  %s2441_s12 = smov 0  }
   0x3 LB: > { %s2456_s13 = sadd.s32 4294967295, %s2371_s12   ;;  %s2175_s14 = sadd.s32 4294967294, %s2371_s12   ;;  %s2371_s12 = sphi %s2441_s12, %s4123_s12   ;;  %s2367_s11 = sphi %s2439_s11, %s4122_s11   ;;  %s2363_s10 = sphi %s2437_s10, %s4121_s10   ;;  %s2359_s30 = sphi %s2435_s30, %s4120_s30  }
   0x4   : > { %s2460_s15 = sadd.s32 1, %s2371_s12   ;;  %s233_s16 = sadd.s32 1, %s2367_s11 }
   0x5   : > { %s230_s17 = ssub.s32 %s2371_s12, %s2460_s15  ;;  %p243_p0 = scmp.ne.s32.totalorder %s2367_s11, %s2363_s10 }
   0x6   : > { %p231_p1 = scmp.eq.s32.totalorder %s230_s17, 0  ;;  %p244_p2 = scmp.eq.s32.totalorder %s2456_s13, 1 }
   0x7   : > { %p249_p3 = scmp.ne.s32.totalorder %s2363_s10, %s2359_s30  ;;  %p250_p4 = scmp.eq.s32.totalorder %s2175_s14, 1 }
   0x8   : > { %s2471_s18 = scalar_select %p231_p1, %s2367_s11, %s233_s16  }
   0x9   : > { %p2473_p5 = por %p244_p2, %p243_p0  ;;  %p2477_p6 = por %p250_p4, %p249_p3 }
   0xa   : > { %p2178_p7 = scmp.ge.s32.totalorder %s2371_s12, 1  ;;  %p310_p8 = scmp.lt.s32.totalorder %s2371_s12, 3 }
   0xc   : > { %p311_p9 = pnand %p2178_p7, %p310_p8 }
   0xe   : > { %314 = sbr.rel (%p311_p9) target bundleno = 1086 (0x43e), region = 56 }
  0x13   : > { %p356_p10 = scmp.lt.s32.totalorder %s2456_s13, 1  ;;  %v408_v0 = vld [vmem:[%s3923_s3 + $0x70] sm:$0xff]  ;;  %v3930_v1 = vmov 0   ;;  %v406_v2 = vld [vmem:[%s3923_s3 + $0x60] sm:$0xff]  ;;  %v409_v3 = vld [vmem:[%s3923_s3 + $0x78] sm:$0xff]  ;;  %vm592_vm0 = vcmask 1041408  }
  0x14   : > { %631 = vmatprep.mubr.bf16.mxu0 %v3930_v1  ;;  %2292 = vset.pattern.permute.xlu0 %v3930_v1  ;;  %v407_v4 = vld [vmem:[%s3923_s3 + $0x68] sm:$0xff]  ;;  %v404_v5 = vld [vmem:[%s3923_s3 + $0x50] sm:$0xff]  ;;  %v405_v10 = vld [vmem:[%s3923_s3 + $0x58] sm:$0xff]  ;;  %vm564_vm1 = vcmask 293888   ;;  %vm816_vm2 = vcmask 138240   ;;  %s2376_s24 = smov 127  }
  0x15   : > { %s2493_s25 = scalar_select %p356_p10, %s2456_s13, 1  ;;  %483 = vperm.xlu0 %2292, %v408_v0   ;;  %2293 = vset.pattern.permute.xlu1 %v3930_v1  ;;  %v402_v11 = vld [vmem:[%s3923_s3 + $0x40] sm:$0xff]  ;;  %v403_v13 = vld [vmem:[%s3923_s3 + $0x48] sm:$0xff]  ;;  %v400_v16 = vld [vmem:[%s3923_s3 + $0x30] sm:$0xff]  ;;  %vm1670_vm4 = vcmask 785408   ;;  %vm1288_vm5 = vcmask 916480  }
  0x16   : > { %473 = vperm.xlu1 %2293, %v406_v2   ;;  %935 = vmatprep.mubr.bf16.mxu1 %v3930_v1  ;;  %v401_v18 = vld [vmem:[%s3923_s3 + $0x38] sm:$0xff]  ;;  %v398_v20 = vld [vmem:[%s3923_s3 + $0x20] sm:$0xff]  ;;  %v399_v21 = vld [vmem:[%s3923_s3 + $0x28] sm:$0xff]  ;;  %s2378_s26 = smov 112   ;;  %s2379_s27 = smov 110   ;;  %vm1416_vm6 = vcmask 908288  }
  0x17   : > { %s2240_s28 = smul.u32 40, %s2493_s25  ;;  %v396_v22 = vld [vmem:[%s3923_s3 + $0x10] sm:$0xff]  ;;  %v397_v23 = vld [vmem:[%s3923_s3 + $0x18] sm:$0xff]  ;;  %v394_v25 = vld [vmem:[%s3923_s3] sm:$0xff]  ;;  %s2380_s29 = smov 96   ;;  %vm1542_vm7 = vcmask 900096  }
  0x18   : > { %s2241_s16 = smul.u32 68, %s2493_s25  ;;  %v395_v26 = vld [vmem:[%s3923_s3 + $0x8] sm:$0xff]  ;;  %v410_v27 = vld [vmem:[%s3923_s3 + $0x80] sm:$0xff]  ;;  %vm2745_vm3 = vmneg %vm816_vm2  ;;  %s2381_s21 = smov 95   ;;  %vm1024_vm8 = vcmask 1039360   ;;  %vm1150_vm9 = vcmask 1031168  }
  0x19   : > { %s360_s22 = scalar_lea.vmem %s3920_s0, %s2240_s28  ;;  %488 = vperm.xlu0 %2292, %v409_v3   ;;  %s2382_s23 = smov 94   ;;  %vm1798_vm10 = vcmask 777216   ;;  %vm1924_vm11 = vcmask 769024  }
  0x1a   : > { %v376_v6 = vld [vmem:[%s360_s22 + $0x20] sm:$0x33]  ;;  %478 = vperm.xlu1 %2293, %v407_v4   ;;  %v2296_v9 = vld [vmem:[%s360_s22 + $0x14] ss:$8 sps:$4 sm:$0xff]   ;;  %s2517_s17 = scalar_lea.vmem %s3922_s2, %s2241_s16  ;;  %v2298_v14 = vld [vmem:[%s360_s22 + $0x10] ss:$8 sps:$4 sm:$0xff]  }
  0x1b   : > { %v2198_v7 = vcombine.high %v376_v6, %v376_v6  ;;  %v2197_v8 = vcombine.low %v376_v6, %v376_v6  ;;  %v2299_v15 = vld [vmem:[%s360_s22 + $0x4] ss:$8 sps:$4 sm:$0xff]   ;;  %v2301_v17 = vld [vmem:[%s360_s22] ss:$8 sps:$4 sm:$0xff]   ;;  %v2304_v28 = vld [vmem:[%s2517_s17 + $0x10] sm:$0xff]   ;;  %s2375_s22 = smov 126  }
  0x1c   : > { %v2302_v19 = vld [vmem:[%s2517_s17] sm:$0xff]   ;;  %v2303_v24 = vld [vmem:[%s2517_s17 + $0x8] sm:$0xff]   ;;  %v2305_v29 = vld [vmem:[%s2517_s17 + $0x18] sm:$0xff]   ;;  %s2377_s16 = smov 111   ;;  %s2239_s14 = sshll.u32 %s2456_s13, 7 }
  0x1d   : > { %2199 = vmatprep.subr.msk.bf16.mxu0 %vm592_vm0, %v2198_v7  ;;  %v594_v12 = vsel %vm592_vm0, %v2197_v8, 0  ;;  %463 = vperm.xlu0 %2292, %v404_v5   ;;  %v2306_v30 = vld [vmem:[%s2517_s17 + $0x20] sm:$0xff]   ;;  %v2307_v31 = vld [vmem:[%s2517_s17 + $0x28] sm:$0xff]   ;;  %v2308_v32 = vld [vmem:[%s2517_s17 + $0x30] sm:$0xff]  }
  0x1e   : > { %610 = vmatpush1.bf16.msra.mxu0 %v594_v12  ;;  %468 = vperm.xlu1 %2293, %v405_v10   ;;  %v2309_v33 = vld [vmem:[%s2517_s17 + $0x38] sm:$0xff]   ;;  %v2310_v34 = vld [vmem:[%s2517_s17 + $0x40] ss:$0 sps:$4 sm:$0xff]   ;;  %s2374_s17 = smov 17  }
  0x1f   : > { %611 = vmatprep.subr.bf16.mxu0 %v2296_v9 }
  0x21   : > { %453 = vperm.xlu0 %2292, %v402_v11  }
  0x22   : > { %612 = vmatpush1.bf16.msra.mxu0 %v2298_v14  ;;  %458 = vperm.xlu1 %2293, %v403_v13  }
  0x23   : > { %613 = vmatprep.subr.bf16.mxu0 %v2299_v15 }
  0x25   : > { %443 = vperm.xlu0 %2292, %v400_v16  }
  0x26   : > { %614 = vmatpush1.bf16.msra.mxu0 %v2301_v17  ;;  %448 = vperm.xlu1 %2293, %v401_v18  }
  0x29   : > { %2200 = vmatmul.mubr.msk.bf16.vlgmr.msra.gmra.mxu0 %vm564_vm1, %v2302_v19  ;;  %433 = vperm.xlu0 %2292, %v398_v20  }
  0x2a   : > { %641 = vmatprep.mubr.bf16.mxu0 %v3930_v1  ;;  %438 = vperm.xlu1 %2293, %v399_v21  }
  0x2d   : > { %423 = vperm.xlu0 %2292, %v396_v22  }
  0x2e   : > { %428 = vperm.xlu1 %2293, %v397_v23  }
  0x31   : > { %2201 = vmatmul.mubr.msk.bf16.gmra.mxu0 %vm564_vm1, %v2303_v24  ;;  %413 = vperm.xlu0 %2292, %v394_v25  }
  0x32   : > { %651 = vmatprep.mubr.bf16.mxu0 %v3930_v1  ;;  %418 = vperm.xlu1 %2293, %v395_v26  }
  0x35   : > { %493 = vperm.xlu0 %2292, %v410_v27  }
  0x39   : > { %2202 = vmatmul.mubr.msk.bf16.gmra.mxu0 %vm564_vm1, %v2304_v28 }
  0x3a   : > { %661 = vmatprep.mubr.bf16.mxu0 %v3930_v1 }
  0x41   : > { %2203 = vmatmul.mubr.msk.bf16.gmra.mxu0 %vm564_vm1, %v2305_v29 }
  0x42   : > { %671 = vmatprep.mubr.bf16.mxu0 %v3930_v1 }
  0x49   : > { %2204 = vmatmul.mubr.msk.bf16.gmra.mxu0 %vm564_vm1, %v2306_v30 }
  0x4a   : > { %681 = vmatprep.mubr.bf16.mxu0 %v3930_v1 }
  0x51   : > { %2205 = vmatmul.mubr.msk.bf16.gmra.mxu0 %vm564_vm1, %v2307_v31 }
  0x52   : > { %691 = vmatprep.mubr.bf16.mxu0 %v3930_v1 }
  0x59   : > { %2206 = vmatmul.mubr.msk.bf16.gmra.mxu0 %vm564_vm1, %v2308_v32 }
  0x5a   : > { %701 = vmatprep.mubr.bf16.mxu0 %v3930_v1 }
  0x61   : > { %2207 = vmatmul.mubr.msk.bf16.gmra.mxu0 %vm564_vm1, %v2309_v33 }
  0x62   : > { %711 = vmatprep.mubr.bf16.mxu0 %v3930_v1 }
  0x69   : > { %2208 = vmatmul.mubr.msk.bf16.gmra.mxu0 %vm564_vm1, %v2310_v34 }
  0x6a   : > { %1215 = vmatprep.mubr.bf16.mxu0 %v3930_v1 }
  0x90   : > { %v2579_v35 = vpop.permute.xlu0 %483 }
  0x91   : > { %v2581_v36 = vpop.permute.xlu1 %473 }
  0x94   : > { %v2583_v37 = vpop.permute.xlu0 %488 }
  0x95   : > { %v2585_v38 = vpop.permute.xlu1 %478 }
  0x98   : > { %v2587_v39 = vpop.permute.xlu0 %463 }
  0x99   : > { %v2589_v40 = vpop.permute.xlu1 %468 }
  0x9c   : > { %v2591_v41 = vpop.permute.xlu0 %453 }
  0x9d   : > { %v2593_v42 = vpop.permute.xlu1 %458 }
  0xa0   : > { %v444_v43 = vpop.permute.xlu0 %443 }
  0xa1   : > { %v2595_v44 = vpop.permute.xlu1 %448 }
  0xa4   : > { %v434_v45 = vpop.permute.xlu0 %433 }
  0xa5   : > { %v439_v46 = vpop.permute.xlu1 %438 }
  0xa8   : > { %v424_v47 = vpop.permute.xlu0 %423 }
  0xa9   : > { %v429_v48 = vpop.permute.xlu1 %428 }
  0xac   : > { %v414_v50 = vpop.permute.xlu0 %413 }
  0xad   : > { %v419_v53 = vpop.permute.xlu1 %418 }
  0xe9   : > { %v633_v49 = vpop.f32.mrf.mxu0 }
  0xea   : > { %v634_v52 = vadd.f32 %v633_v49, %v414_v50 }
  0xeb   : > { %v635_v51 = vpop.f32.mrf.mxu0 }
  0xec   : > { %v636_v55 = vadd.f32 %v635_v51, %v414_v50  ;;  %v720_v58 = vmax.f32 %v634_v52, 0.0 }
  0xed   : > { %v637_v54 = vpop.f32.mrf.mxu0 }
  0xee   : > { %v638_v56 = vadd.f32 %v637_v54, %v419_v53  ;;  %v721_v62 = vmax.f32 %v636_v55, 0.0 }
  0xef   : > { %v639_v57 = vpop.f32.mrf.mxu0 }
  0xf0   : > { %v722_v59 = vmax.f32 %v638_v56, 0.0  ;;  %v640_v60 = vadd.f32 %v639_v57, %v419_v53 }
  0xf1   : > { %v643_v61 = vpop.f32.mrf.mxu0 }
  0xf2   : > { %v752_v63 = vpack.c.bf16 %v722_v59, %v720_v58  ;;  %v723_v0 = vmax.f32 %v640_v60, 0.0  ;;  %v644_v4 = vadd.f32 %v643_v61, %v424_v47 }
  0xf3   : > { %v645_v2 = vpop.f32.mrf.mxu0 }
  0xf4   : > { %v753_v3 = vpack.c.bf16 %v723_v0, %v721_v62  ;;  %784 = vrot.lane.b32.xlu0 %v752_v63, %s2374_s17  ;;  %v646_v6 = vadd.f32 %v645_v2, %v424_v47  ;;  %v724_v9 = vmax.f32 %v644_v4, 0.0 }
  0xf5   : > { %v647_v5 = vpop.f32.mrf.mxu0 }
  0xf6   : > { %v648_v7 = vadd.f32 %v647_v5, %v429_v48  ;;  %786 = vrot.lane.b32.xlu1 %v753_v3, %s2374_s17  ;;  %v725_v13 = vmax.f32 %v646_v6, 0.0 }
  0xf7   : > { %v649_v8 = vpop.f32.mrf.mxu0 }
  0xf8   : > { %v726_v10 = vmax.f32 %v648_v7, 0.0  ;;  %v650_v11 = vadd.f32 %v649_v8, %v429_v48 }
  0xf9   : > { %v653_v12 = vpop.f32.mrf.mxu0 }
  0xfa   : > { %v754_v14 = vpack.c.bf16 %v726_v10, %v724_v9  ;;  %v727_v15 = vmax.f32 %v650_v11, 0.0  ;;  %v654_v18 = vadd.f32 %v653_v12, %v434_v45 }
  0xfb   : > { %v655_v16 = vpop.f32.mrf.mxu0 }
  0xfc   : > { %v755_v17 = vpack.c.bf16 %v727_v15, %v725_v13  ;;  %788 = vrot.lane.b32.xlu0 %v754_v14, %s2374_s17  ;;  %v656_v20 = vadd.f32 %v655_v16, %v434_v45  ;;  %v728_v23 = vmax.f32 %v654_v18, 0.0 }
  0xfd   : > { %v657_v19 = vpop.f32.mrf.mxu0 }
  0xfe   : > { %v658_v21 = vadd.f32 %v657_v19, %v439_v46  ;;  %790 = vrot.lane.b32.xlu1 %v755_v17, %s2374_s17  ;;  %v729_v27 = vmax.f32 %v656_v20, 0.0 }
  0xff   : > { %v659_v22 = vpop.f32.mrf.mxu0 }
 0x100   : > { %v730_v24 = vmax.f32 %v658_v21, 0.0  ;;  %v660_v25 = vadd.f32 %v659_v22, %v439_v46 }
 0x101   : > { %v663_v26 = vpop.f32.mrf.mxu0 }
 0x102   : > { %v756_v28 = vpack.c.bf16 %v730_v24, %v728_v23  ;;  %v731_v29 = vmax.f32 %v660_v25, 0.0  ;;  %v664_v32 = vadd.f32 %v663_v26, %v444_v43 }
 0x103   : > { %v665_v30 = vpop.f32.mrf.mxu0 }
 0x104   : > { %v757_v31 = vpack.c.bf16 %v731_v29, %v729_v27  ;;  %792 = vrot.lane.b32.xlu0 %v756_v28, %s2374_s17  ;;  %v666_v34 = vadd.f32 %v665_v30, %v444_v43  ;;  %v732_v48 = vmax.f32 %v664_v32, 0.0 }
 0x105   : > { %v667_v33 = vpop.f32.mrf.mxu0 }
 0x106   : > { %v668_v45 = vadd.f32 %v667_v33, %v2595_v44  ;;  %794 = vrot.lane.b32.xlu1 %v757_v31, %s2374_s17  ;;  %v733_v51 = vmax.f32 %v666_v34, 0.0 }
 0x107   : > { %v669_v47 = vpop.f32.mrf.mxu0 }
 0x108   : > { %v734_v49 = vmax.f32 %v668_v45, 0.0  ;;  %v670_v46 = vadd.f32 %v669_v47, %v2595_v44 }
 0x109   : > { %v673_v50 = vpop.f32.mrf.mxu0 }
 0x10a   : > { %v758_v52 = vpack.c.bf16 %v734_v49, %v732_v48  ;;  %v735_v53 = vmax.f32 %v670_v46, 0.0  ;;  %v674_v56 = vadd.f32 %v673_v50, %v2591_v41 }
 0x10b   : > { %v675_v54 = vpop.f32.mrf.mxu0 }
 0x10c   : > { %v759_v55 = vpack.c.bf16 %v735_v53, %v733_v51  ;;  %796 = vrot.lane.b32.xlu0 %v758_v52, %s2374_s17  ;;  %v676_v57 = vadd.f32 %v675_v54, %v2591_v41  ;;  %v736_v60 = vmax.f32 %v674_v56, 0.0  ;;  %v2635_v52 = vpop.permute.xlu0 %493 }
 0x10d   : > { %v677_v43 = vpop.f32.mrf.mxu0  ;;  %3960 = vst [vmem:[#allocation7_spill] sm:$0xff] %v2635_v52 }
 0x10e   : > { %v678_v58 = vadd.f32 %v677_v43, %v2593_v42  ;;  %798 = vrot.lane.b32.xlu1 %v759_v55, %s2374_s17  ;;  %v737_v63 = vmax.f32 %v676_v57, 0.0 }
 0x10f   : > { %v679_v59 = vpop.f32.mrf.mxu0 }
 0x110   : > { %v738_v44 = vmax.f32 %v678_v58, 0.0  ;;  %v680_v61 = vadd.f32 %v679_v59, %v2593_v42 }
 0x111   : > { %v683_v62 = vpop.f32.mrf.mxu0 }
 0x112   : > { %v760_v0 = vpack.c.bf16 %v738_v44, %v736_v60  ;;  %v739_v2 = vmax.f32 %v680_v61, 0.0  ;;  %v684_v5 = vadd.f32 %v683_v62, %v2587_v39 }
 0x113   : > { %v685_v3 = vpop.f32.mrf.mxu0 }
 0x114   : > { %v761_v4 = vpack.c.bf16 %v739_v2, %v737_v63  ;;  %800 = vrot.lane.b32.xlu0 %v760_v0, %s2374_s17  ;;  %v686_v6 = vadd.f32 %v685_v3, %v2587_v39  ;;  %v740_v9 = vmax.f32 %v684_v5, 0.0 }
 0x115   : > { %v687_v41 = vpop.f32.mrf.mxu0 }
 0x116   : > { %v688_v7 = vadd.f32 %v687_v41, %v2589_v40  ;;  %802 = vrot.lane.b32.xlu1 %v761_v4, %s2374_s17  ;;  %v741_v12 = vmax.f32 %v686_v6, 0.0 }
 0x117   : > { %v689_v8 = vpop.f32.mrf.mxu0 }
 0x118   : > { %v742_v42 = vmax.f32 %v688_v7, 0.0  ;;  %v690_v10 = vadd.f32 %v689_v8, %v2589_v40 }
 0x119   : > { %v693_v11 = vpop.f32.mrf.mxu0 }
 0x11a   : > { %v762_v13 = vpack.c.bf16 %v742_v42, %v740_v9  ;;  %v743_v14 = vmax.f32 %v690_v10, 0.0  ;;  %v694_v17 = vadd.f32 %v693_v11, %v2581_v36 }
 0x11b   : > { %v695_v15 = vpop.f32.mrf.mxu0 }
 0x11c   : > { %v763_v16 = vpack.c.bf16 %v743_v14, %v741_v12  ;;  %804 = vrot.lane.b32.xlu0 %v762_v13, %s2374_s17  ;;  %v696_v18 = vadd.f32 %v695_v15, %v2581_v36  ;;  %v744_v21 = vmax.f32 %v694_v17, 0.0 }
 0x11d   : > { %v697_v39 = vpop.f32.mrf.mxu0 }
 0x11e   : > { %v698_v19 = vadd.f32 %v697_v39, %v2585_v38  ;;  %806 = vrot.lane.b32.xlu1 %v763_v16, %s2374_s17  ;;  %v745_v24 = vmax.f32 %v696_v18, 0.0 }
 0x11f   : > { %v699_v20 = vpop.f32.mrf.mxu0 }
 0x120   : > { %v746_v40 = vmax.f32 %v698_v19, 0.0  ;;  %v700_v22 = vadd.f32 %v699_v20, %v2585_v38 }
 0x121   : > { %v703_v23 = vpop.f32.mrf.mxu0 }
 0x122   : > { %v764_v25 = vpack.c.bf16 %v746_v40, %v744_v21  ;;  %v747_v26 = vmax.f32 %v700_v22, 0.0  ;;  %v704_v29 = vadd.f32 %v703_v23, %v2579_v35 }
 0x123   : > { %v705_v27 = vpop.f32.mrf.mxu0 }
 0x124   : > { %v765_v28 = vpack.c.bf16 %v747_v26, %v745_v24  ;;  %808 = vrot.lane.b32.xlu0 %v764_v25, %s2374_s17  ;;  %v706_v30 = vadd.f32 %v705_v27, %v2579_v35  ;;  %v748_v33 = vmax.f32 %v704_v29, 0.0 }
 0x125   : > { %v707_v36 = vpop.f32.mrf.mxu0 }
 0x126   : > { %v708_v31 = vadd.f32 %v707_v36, %v2583_v37  ;;  %810 = vrot.lane.b32.xlu1 %v765_v28, %s2374_s17  ;;  %v749_v47 = vmax.f32 %v706_v30, 0.0 }
 0x127   : > { %v709_v32 = vpop.f32.mrf.mxu0 }
 0x128   : > { %v750_v38 = vmax.f32 %v708_v31, 0.0  ;;  %v710_v34 = vadd.f32 %v709_v32, %v2583_v37 }
 0x129   : > { %v2629_v45 = vpop.f32.mrf.mxu0 }
 0x12a   : > { %3958 = vst [vmem:[#allocation5_spill] sm:$0xff] %v2629_v45  ;;  %v766_v48 = vpack.c.bf16 %v750_v38, %v748_v33  ;;  %v751_v49 = vmax.f32 %v710_v34, 0.0 }
 0x12b   : > { %v2631_v46 = vpop.f32.mrf.mxu0 }
 0x12c   : > { %3959 = vst [vmem:[#allocation6_spill] sm:$0xff] %v2631_v46  ;;  %v767_v50 = vpack.c.bf16 %v751_v49, %v749_v47  ;;  %812 = vrot.lane.b32.xlu0 %v766_v48, %s2374_s17 }
 0x12d   : > { %v717_v35 = vpop.f32.mrf.mxu0 }
 0x12e   : > { %814 = vrot.lane.b32.xlu1 %v767_v50, %s2374_s17 }
 0x12f   : > { %v718_v51 = vpop.f32.mrf.mxu0 }
 0x166   : > { %v2637_v53 = vpop.permute.xlu0 %784 }
 0x167   : > { %v2641_v37 = vsel %vm816_vm2, 0, %v2637_v53 }
 0x168   : > { %1102 = vrot.lane.b32.xlu0 %v2641_v37, %s2375_s22  ;;  %976 = vrot.lane.b32.xlu1 %v2641_v37, %s2376_s24  ;;  %v787_v54 = vpop.permute.xlu1 %786 }
 0x169   : > { %v2653_v55 = vsel %vm816_vm2, %v2637_v53, %v787_v54  ;;  %v2656_v56 = vsel %vm816_vm2, %v787_v54, 0 }
 0x16c   : > { %1368 = vrot.lane.b32.xlu0 %v2641_v37, %s2377_s16  ;;  %1240 = vrot.lane.b32.xlu1 %v2641_v37, %s2378_s26 }
 0x16e   : > { %v2670_v43 = vpop.permute.xlu0 %788 }
 0x16f   : > { %v2678_v57 = vsel %vm816_vm2, 0, %v2670_v43 }
 0x170   : > { %980 = vrot.lane.b32.xlu1 %v2656_v56, %s2376_s24  ;;  %978 = vrot.lane.b32.xlu0 %v2653_v55, %s2376_s24  ;;  %v791_v58 = vpop.permute.xlu1 %790 }
 0x171   : > { %v2689_v59 = vsel %vm816_vm2, %v791_v58, 0  ;;  %v2697_v60 = vsel %vm816_vm2, %v2670_v43, %v791_v58 }
 0x174   : > { %1106 = vrot.lane.b32.xlu1 %v2656_v56, %s2375_s22  ;;  %1104 = vrot.lane.b32.xlu0 %v2653_v55, %s2375_s22 }
 0x176   : > { %v793_v44 = vpop.permute.xlu0 %792 }
 0x177   : > { %v2734_v6 = vsel %vm816_vm2, 0, %v793_v44 }
 0x178   : > { %1242 = vrot.lane.b32.xlu1 %v2653_v55, %s2378_s26  ;;  %1244 = vrot.lane.b32.xlu0 %v2656_v56, %s2378_s26  ;;  %v795_v61 = vpop.permute.xlu1 %794 }
 0x179   : > { %v2782_v12 = vsel %vm816_vm2, %v795_v61, 0  ;;  %v2798_v14 = vsel %vm816_vm2, %v793_v44, %v795_v61 }
 0x17c   : > { %1372 = vrot.lane.b32.xlu1 %v2656_v56, %s2377_s16  ;;  %1370 = vrot.lane.b32.xlu0 %v2653_v55, %s2377_s16 }
 0x17e   : > { %v797_v62 = vpop.permute.xlu0 %796 }
 0x17f   : > { %v2842_v16 = vsel %vm816_vm2, 0, %v797_v62 }
 0x180   : > { %1108 = vrot.lane.b32.xlu0 %v2678_v57, %s2375_s22  ;;  %982 = vrot.lane.b32.xlu1 %v2678_v57, %s2376_s24  ;;  %v2703_v63 = vpop.permute.xlu1 %798 }
 0x181   : > { %v2805_v15 = vsel %vm816_vm2, %v797_v62, %v2703_v63  ;;  %v2858_v17 = vsel %vm816_vm2, %v2703_v63, 0 }
 0x184   : > { %1374 = vrot.lane.b32.xlu0 %v2678_v57, %s2377_s16  ;;  %1246 = vrot.lane.b32.xlu1 %v2678_v57, %s2378_s26 }
 0x186   : > { %v2709_v0 = vpop.permute.xlu0 %800 }
 0x187   : > { %v2902_v24 = vsel %vm816_vm2, 0, %v2709_v0 }
 0x188   : > { %986 = vrot.lane.b32.xlu0 %v2689_v59, %s2376_s24  ;;  %1500 = vrot.lane.b32.xlu1 %v2678_v57, %s2379_s27  ;;  %v2711_v2 = vpop.permute.xlu1 %802 }
 0x189   : > { %v2790_v13 = vsel %vm816_vm2, %v2709_v0, %v2711_v2  ;;  %v2930_v30 = vsel %vm816_vm2, %v2711_v2, 0 }
 0x18c   : > { %1110 = vrot.lane.b32.xlu0 %v2697_v60, %s2375_s22  ;;  %984 = vrot.lane.b32.xlu1 %v2697_v60, %s2376_s24 }
 0x18e   : > { %v2717_v3 = vpop.permute.xlu0 %804 }
 0x18f   : > { %v2982_v54 = vsel %vm816_vm2, 0, %v2717_v3 }
 0x190   : > { %1250 = vrot.lane.b32.xlu0 %v2689_v59, %s2378_s26  ;;  %1112 = vrot.lane.b32.xlu1 %v2689_v59, %s2375_s22  ;;  %v2719_v4 = vpop.permute.xlu1 %806 }
 0x191   : > { %v2774_v11 = vsel %vm816_vm2, %v2717_v3, %v2719_v4 }
 0x194   : > { %1376 = vrot.lane.b32.xlu0 %v2697_v60, %s2377_s16  ;;  %1248 = vrot.lane.b32.xlu1 %v2697_v60, %s2378_s26 }
 0x196   : > { %v2725_v5 = vpop.permute.xlu0 %808 }
 0x198   : > { %1504 = vrot.lane.b32.xlu0 %v2689_v59, %s2379_s27  ;;  %1378 = vrot.lane.b32.xlu1 %v2689_v59, %s2377_s16  ;;  %v2727_v41 = vpop.permute.xlu1 %810 }
 0x199   : > { %v2761_v10 = vsel %vm816_vm2, %v2725_v5, %v2727_v41 }
 0x19c   : > { %1630 = vrot.lane.b32.xlu0 %v2697_v60, %s2380_s29  ;;  %1502 = vrot.lane.b32.xlu1 %v2697_v60, %s2379_s27 }
 0x19e   : > { %v2736_v7 = vpop.permute.xlu0 %812 }
 0x1a0   : > { %v2738_v8 = vpop.permute.xlu1 %814  ;;  %1632 = vrot.lane.b32.xlu1 %v2689_v59, %s2380_s29  ;;  %1114 = vrot.lane.b32.xlu0 %v2734_v6, %s2375_s22 }
 0x1a1   : > { %v2752_v42 = vsel %vm816_vm2, %v2736_v7, %v2738_v8 }
 0x1a2   : > { %903 = vmatprep.subr.bf16.mxu1 %v2752_v42 }
 0x1a3   : > { %2210 = vmatpush1.bf16.msk.msra.mxu1 %vm2745_vm3, %v2736_v7 }
 0x1a4   : > { %1380 = vrot.lane.b32.xlu0 %v2734_v6, %s2377_s16  ;;  %988 = vrot.lane.b32.xlu1 %v2734_v6, %s2376_s24 }
 0x1a5   : > { %905 = vmatprep.subr.bf16.mxu1 %v2761_v10 }
 0x1a7   : > { %2212 = vmatpush1.bf16.msk.msra.mxu1 %vm2745_vm3, %v2725_v5 }
 0x1a8   : > { %1634 = vrot.lane.b32.xlu0 %v2734_v6, %s2380_s29  ;;  %1252 = vrot.lane.b32.xlu1 %v2734_v6, %s2378_s26 }
 0x1a9   : > { %907 = vmatprep.subr.bf16.mxu1 %v2774_v11 }
 0x1ab   : > { %2214 = vmatpush1.bf16.msk.msra.mxu1 %vm2745_vm3, %v2717_v3 }
 0x1ac   : > { %992 = vrot.lane.b32.xlu0 %v2782_v12, %s2376_s24  ;;  %1506 = vrot.lane.b32.xlu1 %v2734_v6, %s2379_s27 }
 0x1ad   : > { %909 = vmatprep.subr.bf16.mxu1 %v2790_v13 }
 0x1af   : > { %2216 = vmatpush1.bf16.msk.msra.mxu1 %vm2745_vm3, %v2709_v0  ;;  %v3010_v0 = vsel %vm816_vm2, %v2719_v4, 0 }
 0x1b0   : > { %1116 = vrot.lane.b32.xlu0 %v2798_v14, %s2375_s22  ;;  %990 = vrot.lane.b32.xlu1 %v2798_v14, %s2376_s24 }
 0x1b1   : > { %911 = vmatprep.subr.bf16.mxu1 %v2805_v15 }
 0x1b3   : > { %2218 = vmatpush1.bf16.msk.msra.mxu1 %vm2745_vm3, %v797_v62 }
 0x1b4   : > { %1256 = vrot.lane.b32.xlu0 %v2782_v12, %s2378_s26  ;;  %1118 = vrot.lane.b32.xlu1 %v2782_v12, %s2375_s22 }
 0x1b5   : > { %913 = vmatprep.subr.bf16.mxu1 %v2798_v14 }
 0x1b7   : > { %2220 = vmatpush1.bf16.msk.msra.mxu1 %vm2745_vm3, %v793_v44 }
 0x1b8   : > { %1382 = vrot.lane.b32.xlu0 %v2798_v14, %s2377_s16  ;;  %1254 = vrot.lane.b32.xlu1 %v2798_v14, %s2378_s26 }
 0x1b9   : > { %915 = vmatprep.subr.bf16.mxu1 %v2697_v60 }
 0x1bb   : > { %2222 = vmatpush1.bf16.msk.msra.mxu1 %vm2745_vm3, %v2670_v43 }
 0x1bc   : > { %1510 = vrot.lane.b32.xlu0 %v2782_v12, %s2379_s27  ;;  %1384 = vrot.lane.b32.xlu1 %v2782_v12, %s2377_s16 }
 0x1bd   : > { %917 = vmatprep.subr.bf16.mxu1 %v2653_v55 }
 0x1bf   : > { %2224 = vmatpush1.bf16.msk.msra.mxu1 %vm2745_vm3, %v2637_v53 }
 0x1c0   : > { %1636 = vrot.lane.b32.xlu0 %v2798_v14, %s2380_s29  ;;  %1508 = vrot.lane.b32.xlu1 %v2798_v14, %s2379_s27 }
 0x1c4   : > { %1638 = vrot.lane.b32.xlu1 %v2782_v12, %s2380_s29  ;;  %1120 = vrot.lane.b32.xlu0 %v2842_v16, %s2375_s22 }
 0x1c8   : > { %1386 = vrot.lane.b32.xlu0 %v2842_v16, %s2377_s16  ;;  %994 = vrot.lane.b32.xlu1 %v2842_v16, %s2376_s24 }
 0x1cc   : > { %1640 = vrot.lane.b32.xlu0 %v2842_v16, %s2380_s29  ;;  %1258 = vrot.lane.b32.xlu1 %v2842_v16, %s2378_s26 }
 0x1d0   : > { %998 = vrot.lane.b32.xlu0 %v2858_v17, %s2376_s24  ;;  %1512 = vrot.lane.b32.xlu1 %v2842_v16, %s2379_s27 }
 0x1d4   : > { %1122 = vrot.lane.b32.xlu0 %v2805_v15, %s2375_s22  ;;  %996 = vrot.lane.b32.xlu1 %v2805_v15, %s2376_s24 }
 0x1d8   : > { %1262 = vrot.lane.b32.xlu0 %v2858_v17, %s2378_s26  ;;  %1124 = vrot.lane.b32.xlu1 %v2858_v17, %s2375_s22 }
 0x1da   : > { %v2872_v39 = vpop.permute.xlu1 %976  ;;  %v2874_v18 = vpop.permute.xlu0 %1102 }
 0x1dc   : > { %1388 = vrot.lane.b32.xlu0 %v2805_v15, %s2377_s16  ;;  %1260 = vrot.lane.b32.xlu1 %v2805_v15, %s2378_s26 }
 0x1de   : > { %v2880_v19 = vpop.permute.xlu1 %1240  ;;  %v2882_v20 = vpop.permute.xlu0 %1368 }
 0x1df   : > { %3963 = vst [vmem:[#allocation8_spill] sm:$0xff] %v2880_v19  ;;  %3964 = vst [vmem:[#allocation9_spill] sm:$0xff] %v2882_v20 }
 0x1e0   : > { %1516 = vrot.lane.b32.xlu0 %v2858_v17, %s2379_s27  ;;  %1390 = vrot.lane.b32.xlu1 %v2858_v17, %s2377_s16 }
 0x1e2   : > { %v2888_v21 = vpop.permute.xlu1 %980  ;;  %v2890_v40 = vpop.permute.xlu0 %978 }
 0x1e4   : > { %1642 = vrot.lane.b32.xlu0 %v2805_v15, %s2380_s29  ;;  %1514 = vrot.lane.b32.xlu1 %v2805_v15, %s2379_s27 }
 0x1e6   : > { %v2896_v22 = vpop.permute.xlu1 %1106  ;;  %v2898_v23 = vpop.permute.xlu0 %1104 }
 0x1e8   : > { %1644 = vrot.lane.b32.xlu1 %v2858_v17, %s2380_s29  ;;  %1126 = vrot.lane.b32.xlu0 %v2902_v24, %s2375_s22 }
 0x1ea   : > { %v2908_v25 = vpop.permute.xlu1 %1242  ;;  %v2910_v26 = vpop.permute.xlu0 %1244 }
 0x1eb   : > { %3965 = vst [vmem:[#allocation10_spill] sm:$0xff] %v2908_v25  ;;  %3966 = vst [vmem:[#allocation11_spill] sm:$0xff] %v2910_v26 }
 0x1ec   : > { %1392 = vrot.lane.b32.xlu0 %v2902_v24, %s2377_s16  ;;  %1000 = vrot.lane.b32.xlu1 %v2902_v24, %s2376_s24 }
 0x1ee   : > { %v2916_v27 = vpop.permute.xlu1 %1372  ;;  %v2918_v28 = vpop.permute.xlu0 %1370 }
 0x1ef   : > { %3967 = vst [vmem:[#allocation12_spill] sm:$0xff] %v2916_v27  ;;  %3968 = vst [vmem:[#allocation13_spill] sm:$0xff] %v2918_v28 }
 0x1f0   : > { %1646 = vrot.lane.b32.xlu0 %v2902_v24, %s2380_s29  ;;  %1264 = vrot.lane.b32.xlu1 %v2902_v24, %s2378_s26 }
 0x1f2   : > { %v2924_v29 = vpop.permute.xlu1 %982  ;;  %v2926_v36 = vpop.permute.xlu0 %1108 }
 0x1f4   : > { %1004 = vrot.lane.b32.xlu0 %v2930_v30, %s2376_s24  ;;  %1518 = vrot.lane.b32.xlu1 %v2902_v24, %s2379_s27 }
 0x1f6   : > { %v2936_v31 = vpop.permute.xlu1 %1246  ;;  %v2938_v32 = vpop.permute.xlu0 %1374 }
 0x1f7   : > { %3969 = vst [vmem:[#allocation14_spill] sm:$0xff] %v2936_v31  ;;  %3970 = vst [vmem:[#allocation15_spill] sm:$0xff] %v2938_v32 }
 0x1f8   : > { %1128 = vrot.lane.b32.xlu0 %v2790_v13, %s2375_s22  ;;  %1002 = vrot.lane.b32.xlu1 %v2790_v13, %s2376_s24 }
 0x1fa   : > { %v2944_v33 = vpop.permute.xlu1 %1500  ;;  %v2946_v38 = vpop.permute.xlu0 %986 }
 0x1fb   : > { %3971 = vst [vmem:[#allocation16_spill] sm:$0xff] %v2944_v33 }
 0x1fc   : > { %1268 = vrot.lane.b32.xlu0 %v2930_v30, %s2378_s26  ;;  %1130 = vrot.lane.b32.xlu1 %v2930_v30, %s2375_s22 }
 0x1fe   : > { %v2952_v34 = vpop.permute.xlu1 %984  ;;  %v2954_v47 = vpop.permute.xlu0 %1110 }
 0x200   : > { %1394 = vrot.lane.b32.xlu0 %v2790_v13, %s2377_s16  ;;  %1266 = vrot.lane.b32.xlu1 %v2790_v13, %s2378_s26 }
 0x202   : > { %v2960_v48 = vpop.permute.xlu1 %1112  ;;  %v2962_v49 = vpop.permute.xlu0 %1250 }
 0x203   : > { %3972 = vst [vmem:[#allocation17_spill] sm:$0xff] %v2962_v49 }
 0x204   : > { %1522 = vrot.lane.b32.xlu0 %v2930_v30, %s2379_s27  ;;  %1396 = vrot.lane.b32.xlu1 %v2930_v30, %s2377_s16 }
 0x206   : > { %v2968_v50 = vpop.permute.xlu1 %1248  ;;  %v2970_v35 = vpop.permute.xlu0 %1376 }
 0x207   : > { %3973 = vst [vmem:[#allocation18_spill] sm:$0xff] %v2968_v50  ;;  %3974 = vst [vmem:[#allocation19_spill] sm:$0xff] %v2970_v35 }
 0x208   : > { %1648 = vrot.lane.b32.xlu0 %v2790_v13, %s2380_s29  ;;  %1520 = vrot.lane.b32.xlu1 %v2790_v13, %s2379_s27 }
 0x20a   : > { %v2976_v51 = vpop.permute.xlu1 %1378  ;;  %v2978_v53 = vpop.permute.xlu0 %1504 }
 0x20b   : > { %3975 = vst [vmem:[#allocation20_spill] sm:$0xff] %v2976_v51  ;;  %3976 = vst [vmem:[#allocation21_spill] sm:$0xff] %v2978_v53 }
 0x20c   : > { %1650 = vrot.lane.b32.xlu1 %v2930_v30, %s2380_s29  ;;  %1132 = vrot.lane.b32.xlu0 %v2982_v54, %s2375_s22 }
 0x20e   : > { %v2988_v43 = vpop.permute.xlu1 %1502  ;;  %v2990_v58 = vpop.permute.xlu0 %1630 }
 0x20f   : > { %3977 = vst [vmem:[#allocation22_spill] sm:$0xff] %v2988_v43  ;;  %3978 = vst [vmem:[#allocation23_spill] sm:$0xff] %v2990_v58  ;;  %v3062_v43 = vsel %vm816_vm2, 0, %v2725_v5 }
 0x210   : > { %1398 = vrot.lane.b32.xlu0 %v2982_v54, %s2377_s16  ;;  %1006 = vrot.lane.b32.xlu1 %v2982_v54, %s2376_s24 }
 0x212   : > { %v2996_v44 = vpop.permute.xlu1 %1632  ;;  %v2998_v61 = vpop.permute.xlu0 %1114 }
 0x213   : > { %3979 = vst [vmem:[#allocation24_spill] sm:$0xff] %v2996_v44 }
 0x214   : > { %1652 = vrot.lane.b32.xlu0 %v2982_v54, %s2380_s29  ;;  %1270 = vrot.lane.b32.xlu1 %v2982_v54, %s2378_s26 }
 0x216   : > { %v3004_v62 = vpop.permute.xlu1 %988  ;;  %v3006_v63 = vpop.permute.xlu0 %1380 }
 0x217   : > { %3980 = vst [vmem:[#allocation25_spill] sm:$0xff] %v3006_v63  ;;  %v857_v63 = vsel %vm816_vm2, 0, %v2736_v7 }
 0x218   : > { %1010 = vrot.lane.b32.xlu0 %v3010_v0, %s2376_s24  ;;  %1524 = vrot.lane.b32.xlu1 %v2982_v54, %s2379_s27 }
 0x21a   : > { %v3016_v2 = vpop.permute.xlu1 %1252  ;;  %v3018_v3 = vpop.permute.xlu0 %1634 }
 0x21b   : > { %3981 = vst [vmem:[#allocation26_spill] sm:$0xff] %v3016_v2  ;;  %3982 = vst [vmem:[#allocation27_spill] sm:$0xff] %v3018_v3 }
 0x21c   : > { %1134 = vrot.lane.b32.xlu0 %v2774_v11, %s2375_s22  ;;  %1008 = vrot.lane.b32.xlu1 %v2774_v11, %s2376_s24 }
 0x21e   : > { %v3024_v9 = vpop.permute.xlu1 %1506  ;;  %v3026_v4 = vpop.permute.xlu0 %992 }
 0x21f   : > { %3983 = vst [vmem:[#allocation28_spill] sm:$0xff] %v3024_v9 }
 0x220   : > { %1274 = vrot.lane.b32.xlu0 %v3010_v0, %s2378_s26  ;;  %1136 = vrot.lane.b32.xlu1 %v3010_v0, %s2375_s22 }
 0x222   : > { %v3032_v1 = vpop.permute.xlu1 %990  ;;  %v3034_v46 = vpop.permute.xlu0 %1116 }
 0x224   : > { %1272 = vrot.lane.b32.xlu1 %v2774_v11, %s2378_s26  ;;  %1400 = vrot.lane.b32.xlu0 %v2774_v11, %s2377_s16 }
 0x226   : > { %v3040_v45 = vpop.permute.xlu1 %1118  ;;  %v3042_v52 = vpop.permute.xlu0 %1256 }
 0x227   : > { %3984 = vst [vmem:[#allocation29_spill] sm:$0xff] %v3042_v52 }
 0x228   : > { %1402 = vrot.lane.b32.xlu1 %v3010_v0, %s2377_s16  ;;  %1528 = vrot.lane.b32.xlu0 %v3010_v0, %s2379_s27 }
 0x22a   : > { %v3048_v58 = vpop.permute.xlu1 %1254  ;;  %v3050_v44 = vpop.permute.xlu0 %1382 }
 0x22b   : > { %3985 = vst [vmem:[#allocation30_spill] sm:$0xff] %v3048_v58  ;;  %3986 = vst [vmem:[#allocation31_spill] sm:$0xff] %v3050_v44 }
 0x22c   : > { %1526 = vrot.lane.b32.xlu1 %v2774_v11, %s2379_s27  ;;  %1654 = vrot.lane.b32.xlu0 %v2774_v11, %s2380_s29 }
 0x22e   : > { %v3056_v3 = vpop.permute.xlu1 %1384  ;;  %v3058_v33 = vpop.permute.xlu0 %1510 }
 0x22f   : > { %3987 = vst [vmem:[#allocation32_spill] sm:$0xff] %v3056_v3  ;;  %3988 = vst [vmem:[#allocation33_spill] sm:$0xff] %v3058_v33  ;;  %v902_v3 = vld [vmem:[%s3924_s4] sm:$0xf] }
 0x230   : > { %1656 = vrot.lane.b32.xlu1 %v3010_v0, %s2380_s29  ;;  %1138 = vrot.lane.b32.xlu0 %v3062_v43, %s2375_s22 }
 0x231   : > { %936 = vmatmul.mubr.bf16.vlgmr.msra.gmra.mxu1 %v902_v3  ;;  %v3167_v3 = vsel %vm816_vm2, %v2738_v8, 0 }
 0x232   : > { %v3068_v53 = vpop.permute.xlu1 %1508  ;;  %v3070_v9 = vpop.permute.xlu0 %1636 }
 0x233   : > { %3989 = vst [vmem:[#allocation34_spill] sm:$0xff] %v3068_v53  ;;  %3990 = vst [vmem:[#allocation35_spill] sm:$0xff] %v3070_v9  ;;  %v3090_v9 = vsel %vm816_vm2, %v2727_v41, 0 }
 0x234   : > { %1012 = vrot.lane.b32.xlu1 %v3062_v43, %s2376_s24  ;;  %1404 = vrot.lane.b32.xlu0 %v3062_v43, %s2377_s16 }
 0x236   : > { %v3076_v33 = vpop.permute.xlu1 %1638  ;;  %v3078_v5 = vpop.permute.xlu0 %1120 }
 0x237   : > { %3991 = vst [vmem:[#allocation36_spill] sm:$0xff] %v3076_v33 }
 0x238   : > { %1276 = vrot.lane.b32.xlu1 %v3062_v43, %s2378_s26  ;;  %1658 = vrot.lane.b32.xlu0 %v3062_v43, %s2380_s29 }
 0x23a   : > { %v3084_v20 = vpop.permute.xlu1 %994  ;;  %v3086_v53 = vpop.permute.xlu0 %1386 }
 0x23b   : > { %3992 = vst [vmem:[#allocation37_spill] sm:$0xff] %v3086_v53 }
 0x23c   : > { %1530 = vrot.lane.b32.xlu1 %v3062_v43, %s2379_s27  ;;  %1016 = vrot.lane.b32.xlu0 %v3090_v9, %s2376_s24 }
 0x23e   : > { %v3096_v33 = vpop.permute.xlu1 %1258  ;;  %v3098_v28 = vpop.permute.xlu0 %1640 }
 0x23f   : > { %3993 = vst [vmem:[#allocation38_spill] sm:$0xff] %v3096_v33  ;;  %3994 = vst [vmem:[#allocation39_spill] sm:$0xff] %v3098_v28 }
 0x240   : > { %1014 = vrot.lane.b32.xlu1 %v2761_v10, %s2376_s24  ;;  %1140 = vrot.lane.b32.xlu0 %v2761_v10, %s2375_s22 }
 0x242   : > { %v3104_v27 = vpop.permute.xlu1 %1512  ;;  %v3106_v41 = vpop.permute.xlu0 %998 }
 0x243   : > { %3995 = vst [vmem:[#allocation40_spill] sm:$0xff] %v3104_v27 }
 0x244   : > { %1142 = vrot.lane.b32.xlu1 %v3090_v9, %s2375_s22  ;;  %1280 = vrot.lane.b32.xlu0 %v3090_v9, %s2378_s26 }
 0x246   : > { %v3112_v32 = vpop.permute.xlu1 %996  ;;  %v3114_v19 = vpop.permute.xlu0 %1122 }
 0x248   : > { %1278 = vrot.lane.b32.xlu1 %v2761_v10, %s2378_s26  ;;  %1406 = vrot.lane.b32.xlu0 %v2761_v10, %s2377_s16 }
 0x24a   : > { %v3120_v28 = vpop.permute.xlu1 %1124  ;;  %v3122_v27 = vpop.permute.xlu0 %1262 }
 0x24b   : > { %3996 = vst [vmem:[#allocation41_spill] sm:$0xff] %v3122_v27 }
 0x24c   : > { %1408 = vrot.lane.b32.xlu1 %v3090_v9, %s2377_s16  ;;  %1534 = vrot.lane.b32.xlu0 %v3090_v9, %s2379_s27 }
 0x24e   : > { %v3128_v35 = vpop.permute.xlu1 %1260  ;;  %v3130_v51 = vpop.permute.xlu0 %1388 }
 0x24f   : > { %3997 = vst [vmem:[#allocation42_spill] sm:$0xff] %v3128_v35  ;;  %3998 = vst [vmem:[#allocation43_spill] sm:$0xff] %v3130_v51 }
 0x250   : > { %1532 = vrot.lane.b32.xlu1 %v2761_v10, %s2379_s27  ;;  %1660 = vrot.lane.b32.xlu0 %v2761_v10, %s2380_s29 }
 0x252   : > { %v3136_v25 = vpop.permute.xlu1 %1390  ;;  %v3138_v26 = vpop.permute.xlu0 %1516 }
 0x253   : > { %3999 = vst [vmem:[#allocation44_spill] sm:$0xff] %v3136_v25  ;;  %4000 = vst [vmem:[#allocation45_spill] sm:$0xff] %v3138_v26  ;;  %v4003_v26 = vmov 0  }
 0x254   : > { %1662 = vrot.lane.b32.xlu1 %v3090_v9, %s2380_s29  ;;  %1144 = vrot.lane.b32.xlu0 %v857_v63, %s2375_s22 }
 0x255   : > { %1089 = vmatprep.mubr.bf16.mxu1 %v4003_v26 }
 0x256   : > { %v3145_v31 = vpop.permute.xlu1 %1514  ;;  %v3147_v44 = vpop.permute.xlu0 %1642 }
 0x257   : > { %4001 = vst [vmem:[#allocation46_spill] sm:$0xff] %v3145_v31  ;;  %4002 = vst [vmem:[#allocation47_spill] sm:$0xff] %v3147_v44 }
 0x258   : > { %1018 = vrot.lane.b32.xlu1 %v857_v63, %s2376_s24  ;;  %1410 = vrot.lane.b32.xlu0 %v857_v63, %s2377_s16 }
 0x25a   : > { %v3155_v7 = vpop.permute.xlu1 %1644  ;;  %v3157_v50 = vpop.permute.xlu0 %1126 }
 0x25b   : > { %4004 = vst [vmem:[#allocation48_spill] sm:$0xff] %v3155_v7 }
 0x25c   : > { %1282 = vrot.lane.b32.xlu1 %v857_v63, %s2378_s26  ;;  %1664 = vrot.lane.b32.xlu0 %v857_v63, %s2380_s29 }
 0x25e   : > { %v3161_v44 = vpop.permute.xlu1 %1000  ;;  %v3163_v31 = vpop.permute.xlu0 %1392 }
 0x25f   : > { %4005 = vst [vmem:[#allocation49_spill] sm:$0xff] %v3163_v31 }
 0x260   : > { %1536 = vrot.lane.b32.xlu1 %v857_v63, %s2379_s27  ;;  %1022 = vrot.lane.b32.xlu0 %v3167_v3, %s2376_s24 }
 0x262   : > { %v3172_v7 = vpop.permute.xlu1 %1264  ;;  %v3174_v49 = vpop.permute.xlu0 %1646 }
 0x263   : > { %4006 = vst [vmem:[#allocation50_spill] sm:$0xff] %v3172_v7  ;;  %4007 = vst [vmem:[#allocation51_spill] sm:$0xff] %v3174_v49 }
 0x264   : > { %1020 = vrot.lane.b32.xlu1 %v2752_v42, %s2376_s24  ;;  %1146 = vrot.lane.b32.xlu0 %v2752_v42, %s2375_s22  ;;  %s2238_s24 = sshll.u32 %s2493_s25, 3  ;;  %s353_s25 = sand.u32 1, %s2363_s10  }
 0x266   : > { %v3180_v53 = vpop.permute.xlu1 %1518  ;;  %v3182_v2 = vpop.permute.xlu0 %1004 }
 0x267   : > { %4008 = vst [vmem:[#allocation52_spill] sm:$0xff] %v3180_v53 }
 0x268   : > { %1148 = vrot.lane.b32.xlu1 %v3167_v3, %s2375_s22  ;;  %1628 = vrot.lane.b32.xlu0 %v2678_v57, %s2380_s29  ;;  %s2090_s22 = scalar_lea.hbm %s3929_s9, %s2239_s14 }
 0x26a   : > { %v3188_v8 = vpop.permute.xlu1 %1002  ;;  %v3190_v51 = vpop.permute.xlu0 %1128 }
 0x26c   : > { %1496 = vrot.lane.b32.xlu1 %v2653_v55, %s2379_s27  ;;  %1498 = vrot.lane.b32.xlu0 %v2656_v56, %s2379_s27 }
 0x26e   : > { %v3196_v49 = vpop.permute.xlu1 %1130  ;;  %v3198_v53 = vpop.permute.xlu0 %1268 }
 0x26f   : > { %4009 = vst [vmem:[#allocation53_spill] sm:$0xff] %v3198_v53 }
 0x270   : > { %1494 = vrot.lane.b32.xlu1 %v2641_v37, %s2379_s27  ;;  %1624 = vrot.lane.b32.xlu0 %v2653_v55, %s2380_s29 }
 0x272   : > { %v3204_v25 = vpop.permute.xlu1 %1266  ;;  %v3206_v58 = vpop.permute.xlu0 %1394 }
 0x273   : > { %4010 = vst [vmem:[#allocation54_spill] sm:$0xff] %v3204_v25  ;;  %4011 = vst [vmem:[#allocation55_spill] sm:$0xff] %v3206_v58 }
 0x274   : > { %1626 = vrot.lane.b32.xlu1 %v2656_v56, %s2380_s29  ;;  %1622 = vrot.lane.b32.xlu0 %v2641_v37, %s2380_s29 }
 0x276   : > { %v3212_v52 = vpop.permute.xlu1 %1396  ;;  %v3214_v31 = vpop.permute.xlu0 %1522 }
 0x277   : > { %4012 = vst [vmem:[#allocation56_spill] sm:$0xff] %v3212_v52  ;;  %4013 = vst [vmem:[#allocation57_spill] sm:$0xff] %v3214_v31 }
 0x278   : > { %1792 = vrot.lane.b32.xlu1 %v857_v63, %s2381_s21  ;;  %1918 = vrot.lane.b32.xlu0 %v857_v63, %s2382_s23 }
 0x27a   : > { %v3218_v33 = vpop.permute.xlu1 %1520  ;;  %v3220_v35 = vpop.permute.xlu0 %1648 }
 0x27b   : > { %4014 = vst [vmem:[#allocation58_spill] sm:$0xff] %v3218_v33  ;;  %4015 = vst [vmem:[#allocation59_spill] sm:$0xff] %v3220_v35 }
 0x27c   : > { %1788 = vrot.lane.b32.xlu1 %v2761_v10, %s2381_s21  ;;  %1790 = vrot.lane.b32.xlu0 %v3090_v9, %s2381_s21 }
 0x27e   : > { %v3226_v58 = vpop.permute.xlu1 %1650  ;;  %v3228_v52 = vpop.permute.xlu0 %1132 }
 0x27f   : > { %4016 = vst [vmem:[#allocation60_spill] sm:$0xff] %v3226_v58 }
 0x280   : > { %1786 = vrot.lane.b32.xlu1 %v3062_v43, %s2381_s21  ;;  %1286 = vrot.lane.b32.xlu0 %v3167_v3, %s2378_s26 }
 0x282   : > { %v3234_v63 = vpop.permute.xlu1 %1006  ;;  %v3236_v33 = vpop.permute.xlu0 %1398 }
 0x283   : > { %4017 = vst [vmem:[#allocation61_spill] sm:$0xff] %v3236_v33 }
 0x284   : > { %1284 = vrot.lane.b32.xlu1 %v2752_v42, %s2378_s26  ;;  %1412 = vrot.lane.b32.xlu0 %v2752_v42, %s2377_s16  ;;  %s2384_s26 = smov [#allocation2]  }
 0x286   : > { %v3242_v35 = vpop.permute.xlu1 %1270  ;;  %v3244_v58 = vpop.permute.xlu0 %1652 }
 0x287   : > { %4018 = vst [vmem:[#allocation62_spill] sm:$0xff] %v3242_v35  ;;  %4019 = vst [vmem:[#allocation63_spill] sm:$0xff] %v3244_v58 }
 0x288   : > { %1414 = vrot.lane.b32.xlu1 %v3167_v3, %s2377_s16  ;;  %1914 = vrot.lane.b32.xlu0 %v2761_v10, %s2382_s23 }
 0x28a   : > { %v3250_v31 = vpop.permute.xlu1 %1524  ;;  %v3252_v27 = vpop.permute.xlu0 %1010 }
 0x28b   : > { %4020 = vst [vmem:[#allocation64_spill] sm:$0xff] %v3250_v31 }
 0x28c   : > { %1916 = vrot.lane.b32.xlu1 %v3090_v9, %s2382_s23  ;;  %1912 = vrot.lane.b32.xlu0 %v3062_v43, %s2382_s23 }
 0x28e   : > { %v3258_v33 = vpop.permute.xlu1 %1008  ;;  %v3260_v7 = vpop.permute.xlu0 %1134 }
 0x290   : > { %1782 = vrot.lane.b32.xlu1 %v2774_v11, %s2381_s21  ;;  %1784 = vrot.lane.b32.xlu0 %v3010_v0, %s2381_s21 }
 0x292   : > { %v3266_v10 = vpop.permute.xlu1 %1136  ;;  %v3268_v58 = vpop.permute.xlu0 %1274 }
 0x293   : > { %4021 = vst [vmem:[#allocation65_spill] sm:$0xff] %v3268_v58 }
 0x294   : > { %1780 = vrot.lane.b32.xlu1 %v2982_v54, %s2381_s21  ;;  %1908 = vrot.lane.b32.xlu0 %v2774_v11, %s2382_s23 }
 0x296   : > { %v3274_v43 = vpop.permute.xlu1 %1272  ;;  %v3276_v9 = vpop.permute.xlu0 %1400 }
 0x297   : > { %4022 = vst [vmem:[#allocation66_spill] sm:$0xff] %v3274_v43  ;;  %4023 = vst [vmem:[#allocation67_spill] sm:$0xff] %v3276_v9 }
 0x298   : > { %1910 = vrot.lane.b32.xlu1 %v3010_v0, %s2382_s23  ;;  %1906 = vrot.lane.b32.xlu0 %v2982_v54, %s2382_s23 }
 0x29a   : > { %v3282_v31 = vpop.permute.xlu1 %1402  ;;  %v3284_v25 = vpop.permute.xlu0 %1528 }
 0x29b   : > { %4024 = vst [vmem:[#allocation68_spill] sm:$0xff] %v3282_v31  ;;  %4025 = vst [vmem:[#allocation69_spill] sm:$0xff] %v3284_v25 }
 0x29c   : > { %1776 = vrot.lane.b32.xlu1 %v2790_v13, %s2381_s21  ;;  %1778 = vrot.lane.b32.xlu0 %v2930_v30, %s2381_s21 }
 0x29e   : > { %v3290_v11 = vpop.permute.xlu1 %1526  ;;  %v3292_v53 = vpop.permute.xlu0 %1654 }
 0x29f   : > { %4026 = vst [vmem:[#allocation70_spill] sm:$0xff] %v3290_v11  ;;  %4027 = vst [vmem:[#allocation71_spill] sm:$0xff] %v3292_v53 }
 0x2a0   : > { %1774 = vrot.lane.b32.xlu1 %v2902_v24, %s2381_s21  ;;  %1540 = vrot.lane.b32.xlu0 %v3167_v3, %s2379_s27 }
 0x2a2   : > { %v1657_v54 = vpop.permute.xlu1 %1656  ;;  %v3298_v0 = vpop.permute.xlu0 %1138 }
 0x2a3   : > { %v3302_v25 = vsel %vm1670_vm4, %v3292_v53, %v1657_v54 }
 0x2a4   : > { %4028 = vst [vmem:[#allocation72_spill] sm:$0xff] %v3302_v25  ;;  %1538 = vrot.lane.b32.xlu1 %v2752_v42, %s2379_s27  ;;  %1666 = vrot.lane.b32.xlu0 %v2752_v42, %s2380_s29  ;;  %s365_s27 = scalar_lea.vmem %s3921_s1, %s2238_s24  ;;  %s2078_s24 = scalar_lea.sflag [#allocation3], %s353_s25 }
 0x2a6   : > { %v3308_v11 = vpop.permute.xlu1 %1012  ;;  %v1405_v9 = vpop.permute.xlu0 %1404 }
 0x2a8   : > { %1668 = vrot.lane.b32.xlu1 %v3167_v3, %s2380_s29  ;;  %1902 = vrot.lane.b32.xlu0 %v2790_v13, %s2382_s23  ;;  %s2179_s29 = sshll.u32 %s353_s25, 3 }
 0x2a9   : > { %s355_s28 = scalar_lea.vmem [#allocation2], %s2179_s29 }
 0x2aa   : > { %v1277_v31 = vpop.permute.xlu1 %1276  ;;  %v1659_v35 = vpop.permute.xlu0 %1658 }
 0x2ac   : > { %1904 = vrot.lane.b32.xlu1 %v2930_v30, %s2382_s23  ;;  %1796 = vrot.lane.b32.xlu0 %v3167_v3, %s2381_s21 }
 0x2ae   : > { %v1531_v54 = vpop.permute.xlu1 %1530  ;;  %v1017_v53 = vpop.permute.xlu0 %1016 }
 0x2b0   : > { %1794 = vrot.lane.b32.xlu1 %v2752_v42, %s2381_s21  ;;  %1920 = vrot.lane.b32.xlu0 %v2752_v42, %s2382_s23 }
 0x2b2   : > { %v3322_v25 = vpop.permute.xlu1 %1014  ;;  %v3324_v43 = vpop.permute.xlu0 %1140 }
 0x2b4   : > { %1922 = vrot.lane.b32.xlu1 %v3167_v3, %s2382_s23  ;;  %1900 = vrot.lane.b32.xlu0 %v2902_v24, %s2382_s23 }
 0x2b6   : > { %v3330_v13 = vpop.permute.xlu1 %1142  ;;  %v3332_v30 = vpop.permute.xlu0 %1280 }
 0x2b7   : > { %4029 = vst [vmem:[#allocation73_spill] sm:$0xff] %v3332_v30 }
 0x2b8   : > { %1770 = vrot.lane.b32.xlu1 %v2805_v15, %s2381_s21  ;;  %1772 = vrot.lane.b32.xlu0 %v2858_v17, %s2381_s21 }
 0x2ba   : > { %v3338_v42 = vpop.permute.xlu1 %1278  ;;  %v3340_v58 = vpop.permute.xlu0 %1406 }
 0x2bb   : > { %4030 = vst [vmem:[#allocation74_spill] sm:$0xff] %v3340_v58  ;;  %v3344_v3 = vsel %vm1288_vm5, %v1277_v31, %v3338_v42  ;;  %v3348_v24 = vsel %vm1416_vm6, %v1405_v9, %v3340_v58 }
 0x2bc   : > { %4031 = vst [vmem:[#allocation75_spill] sm:$0xff] %v3344_v3  ;;  %4032 = vst [vmem:[#allocation76_spill] sm:$0xff] %v3348_v24  ;;  %1768 = vrot.lane.b32.xlu1 %v2842_v16, %s2381_s21  ;;  %1896 = vrot.lane.b32.xlu0 %v2805_v15, %s2382_s23 }
 0x2be   : > { %v3354_v26 = vpop.permute.xlu1 %1408  ;;  %v1535_v30 = vpop.permute.xlu0 %1534 }
 0x2c0   : > { %1898 = vrot.lane.b32.xlu1 %v2858_v17, %s2382_s23  ;;  %1894 = vrot.lane.b32.xlu0 %v2842_v16, %s2382_s23 }
 0x2c2   : > { %v1533_v31 = vpop.permute.xlu1 %1532  ;;  %v1661_v3 = vpop.permute.xlu0 %1660 }
 0x2c3   : > { %v3361_v9 = vsel %vm1542_vm7, %v1531_v54, %v1533_v31  ;;  %v3364_v24 = vsel %vm1670_vm4, %v1659_v35, %v1661_v3  ;;  %v3367_v15 = vsel %vm1542_vm7, %v1533_v31, %v1535_v30 }
 0x2c4   : > { %4033 = vst [vmem:[#allocation77_spill] sm:$0xff] %v3361_v9  ;;  %4034 = vst [vmem:[#allocation78_spill] sm:$0xff] %v3364_v24  ;;  %1764 = vrot.lane.b32.xlu1 %v2798_v14, %s2381_s21  ;;  %1766 = vrot.lane.b32.xlu0 %v2782_v12, %s2381_s21 }
 0x2c6   : > { %v1663_v17 = vpop.permute.xlu1 %1662  ;;  %v1145_v16 = vpop.permute.xlu0 %1144 }
 0x2c7   : > { %v3374_v58 = vsel %vm1670_vm4, %v1661_v3, %v1663_v17 }
 0x2c8   : > { %4035 = vst [vmem:[#allocation79_spill] sm:$0xff] %v3374_v58  ;;  %1762 = vrot.lane.b32.xlu1 %v2734_v6, %s2381_s21  ;;  %1890 = vrot.lane.b32.xlu0 %v2798_v14, %s2382_s23 }
 0x2ca   : > { %v1019_v35 = vpop.permute.xlu1 %1018  ;;  %v3380_v54 = vpop.permute.xlu0 %1410 }
 0x2cc   : > { %1892 = vrot.lane.b32.xlu1 %v2782_v12, %s2382_s23  ;;  %1888 = vrot.lane.b32.xlu0 %v2734_v6, %s2382_s23 }
 0x2ce   : > { %v3386_v30 = vpop.permute.xlu1 %1282  ;;  %v3388_v31 = vpop.permute.xlu0 %1664 }
 0x2d0   : > { %1758 = vrot.lane.b32.xlu1 %v2697_v60, %s2381_s21  ;;  %1760 = vrot.lane.b32.xlu0 %v2689_v59, %s2381_s21 }
 0x2d2   : > { %v3394_v14 = vpop.permute.xlu1 %1536  ;;  %v1023_v3 = vpop.permute.xlu0 %1022 }
 0x2d4   : > { %1756 = vrot.lane.b32.xlu1 %v2678_v57, %s2381_s21  ;;  %1884 = vrot.lane.b32.xlu0 %v2697_v60, %s2382_s23  ;;  %v1038_v60 = vsel %vm1024_vm8, %v3322_v25, %v1017_v53 }
 0x2d6   : > { %v1021_v6 = vpop.permute.xlu1 %1020  ;;  %v1147_v12 = vpop.permute.xlu0 %1146 }
 0x2d7   : > { %v1039_v17 = vsel %vm1024_vm8, %v1019_v35, %v1021_v6  ;;  %v1040_v24 = vsel %vm1024_vm8, %v1021_v6, %v1023_v3 }
 0x2d8   : > { %1886 = vrot.lane.b32.xlu1 %v2689_v59, %s2382_s23  ;;  %1882 = vrot.lane.b32.xlu0 %v2678_v57, %s2382_s23  ;;  %v1037_v57 = vsel %vm1024_vm8, %v3308_v11, %v3322_v25  ;;  %v1165_v59 = vsel %vm1150_vm9, %v1145_v16, %v1147_v12  ;;  %v1163_v25 = vsel %vm1150_vm9, %v3298_v0, %v3324_v43 }
 0x2d9   : > { %1057 = vmatprep.subr.bf16.mxu1 %v1040_v24  ;;  %v1164_v24 = vsel %vm1150_vm9, %v3324_v43, %v3330_v13  ;;  %v1034_v13 = vsel %vm1024_vm8, %v3188_v8, %v3182_v2  ;;  %v1162_v16 = vsel %vm1150_vm9, %v3260_v7, %v3266_v10  ;;  %v1161_v2 = vsel %vm1150_vm9, %v3228_v52, %v3260_v7  ;;  %v2029_v10 = vld [vmem:[%s3927_s7] sm:$0xf] }
 0x2da   : > { %1058 = vmatpush1.bf16.msra.mxu1 %v1039_v17  ;;  %v1149_v58 = vpop.permute.xlu1 %1148  ;;  %v3408_v9 = vpop.permute.xlu0 %1628  ;;  %v1160_v52 = vsel %vm1150_vm9, %v3190_v51, %v3196_v49  ;;  %v1159_v49 = vsel %vm1150_vm9, %v3157_v50, %v3190_v51  ;;  %v2043_v50 = vld [vmem:[%s3928_s8] sm:$0xf]  ;;  %v1028_v51 = vsel %vm1024_vm8, %v2952_v34, %v2946_v38 }
 0x2db   : > { %1059 = vmatprep.subr.bf16.mxu1 %v1038_v60  ;;  %v1166_v35 = vsel %vm1150_vm9, %v1147_v12, %v1149_v58  ;;  %v1036_v58 = vsel %vm1024_vm8, %v3258_v33, %v3252_v27  ;;  %v1035_v27 = vsel %vm1024_vm8, %v3234_v63, %v3258_v33  ;;  %v1033_v33 = vsel %vm1024_vm8, %v3161_v44, %v3188_v8  ;;  %v2002_v63 = vld [vmem:[%s3925_s5] sm:$0xff] }
 0x2dc   : > { %1752 = vrot.lane.b32.xlu1 %v2653_v55, %s2381_s21  ;;  %1754 = vrot.lane.b32.xlu0 %v2656_v56, %s2381_s21  ;;  %v1032_v44 = vsel %vm1024_vm8, %v3112_v32, %v3106_v41  ;;  %v1031_v41 = vsel %vm1024_vm8, %v3084_v20, %v3112_v32  ;;  %v1030_v60 = vsel %vm1024_vm8, %v3032_v1, %v3026_v4 }
 0x2dd   : > { %1183 = vmatprep.subr.bf16.mxu0 %v1166_v35  ;;  %v1158_v35 = vsel %vm1150_vm9, %v3114_v19, %v3120_v28  ;;  %v1029_v20 = vsel %vm1024_vm8, %v3004_v62, %v3032_v1  ;;  %v1157_v32 = vsel %vm1150_vm9, %v3078_v5, %v3114_v19  ;;  %v1156_v4 = vsel %vm1150_vm9, %v3034_v46, %v3040_v45 }
 0x2de   : > { %1060 = vmatpush1.bf16.msra.mxu1 %v1037_v57  ;;  %1184 = vmatpush1.bf16.msra.mxu0 %v1165_v59  ;;  %v1497_v53 = vpop.permute.xlu1 %1496  ;;  %v1499_v3 = vpop.permute.xlu0 %1498  ;;  %v1027_v62 = vsel %vm1024_vm8, %v2924_v29, %v2952_v34  ;;  %v1155_v5 = vsel %vm1150_vm9, %v2998_v61, %v3034_v46  ;;  %v1026_v45 = vsel %vm1024_vm8, %v2890_v40, %v2888_v21  ;;  %v2225_v61 = vld [vmem:[%s3924_s4 + $0x4] sm:$0xf] }
 0x2df   : > { %1061 = vmatprep.subr.bf16.mxu1 %v1036_v58  ;;  %1185 = vmatprep.subr.bf16.mxu0 %v1164_v24  ;;  %v3426_v6 = vsel %vm1542_vm7, %v1497_v53, %v1499_v3  ;;  %v1154_v59 = vsel %vm1150_vm9, %v2954_v47, %v2960_v48  ;;  %v1025_v46 = vsel %vm1024_vm8, %v2872_v39, %v2890_v40 }
 0x2e0   : > { %1750 = vrot.lane.b32.xlu1 %v2641_v37, %s2381_s21  ;;  %1878 = vrot.lane.b32.xlu0 %v2653_v55, %s2382_s23  ;;  %v1153_v29 = vsel %vm1150_vm9, %v2926_v36, %v2954_v47  ;;  %v1152_v34 = vsel %vm1150_vm9, %v2898_v23, %v2896_v22  ;;  %v1151_v40 = vsel %vm1150_vm9, %v2874_v18, %v2898_v23  ;;  %v4036_v36 = vld [vmem:[#allocation73_spill] sm:$0xff]  ;;  %v4038_v23 = vld [vmem:[#allocation75_spill] sm:$0xff]  ;;  %s2092_s21 = sshll.u32 %s355_s28, 4  ;;  %s2093_s21 = int_to_ptr.vmem [resolvable:$true] %s2092_s21 }
 0x2e1   : > { %v1302_v47 = vsel %vm1288_vm5, %v3338_v42, %v4036_v36  ;;  %s2311_s16 = scalar_lea.vmem %s2093_s21, 128 }
 0x2e2   : > { %1062 = vmatpush1.bf16.msra.mxu1 %v1035_v27  ;;  %1186 = vmatpush1.bf16.msra.mxu0 %v1163_v25  ;;  %v1495_v11 = vpop.permute.xlu1 %1494  ;;  %v1625_v55 = vpop.permute.xlu0 %1624  ;;  %v4037_v27 = vmov 0   ;;  %p2312_p11 = scmp.ne.s32.totalorder %s2093_s21, %s2311_s16 }
 0x2e3   : > { %v3445_v12 = vsel %vm1542_vm7, %v1495_v11, %v1497_v53  ;;  %1063 = vmatprep.subr.bf16.mxu1 %v1034_v13  ;;  %1187 = vmatprep.subr.bf16.mxu0 %v1162_v16  ;;  %v4039_v11 = vld [vmem:[#allocation65_spill] sm:$0xff]  ;;  %v4040_v13 = vld [vmem:[#allocation66_spill] sm:$0xff] }
 0x2e4   : > { %1880 = vrot.lane.b32.xlu1 %v2656_v56, %s2382_s23  ;;  %1876 = vrot.lane.b32.xlu0 %v2641_v37, %s2382_s23  ;;  %v2010_v37 = vld [vmem:[%s3926_s6] sm:$0xff]  ;;  %v1300_v16 = vsel %vm1288_vm5, %v4040_v13, %v4039_v11  ;;  %p2313_p12 = pnand %p2312_p11, %p2473_p5 }
 0x2e5   : > { %v2018_v0 = vsub.f32 1.0, %v2010_v37 }
 0x2e6   : > { %1064 = vmatpush1.bf16.msra.mxu1 %v1033_v33  ;;  %1188 = vmatpush1.bf16.msra.mxu0 %v1161_v2  ;;  %v1627_v56 = vpop.permute.xlu1 %1626  ;;  %v1623_v7 = vpop.permute.xlu0 %1622  ;;  %p2314_p13 = pneg %p2313_p12 }
 0x2e7   : > { %1065 = vmatprep.subr.bf16.mxu1 %v1032_v44  ;;  %1189 = vmatprep.subr.bf16.mxu0 %v1160_v52  ;;  %v3473_v8 = vsel %vm1670_vm4, %v1623_v7, %v1625_v55  ;;  %v3476_v43 = vsel %vm1670_vm4, %v1625_v55, %v1627_v56  ;;  %v4041_v55 = vld [vmem:[#allocation74_spill] sm:$0xff]  ;;  %v4044_v44 = vld [vmem:[#allocation53_spill] sm:$0xff]  ;;  %v4046_v7 = vld [vmem:[#allocation68_spill] sm:$0xff] }
 0x2e8   : > { %2005 = vperm.xlu1 %2293, %v2002_v63   ;;  %2032 = vperm.xlu0 %2292, %v2029_v10   ;;  %v1430_v33 = vsel %vm1416_vm6, %v4041_v55, %v3354_v26  ;;  %v4042_v63 = vld [vmem:[#allocation62_spill] sm:$0xff] }
 0x2e9   : > { %v1299_v10 = vsel %vm1288_vm5, %v4042_v63, %v4040_v13  ;;  %v4045_v26 = vld [vmem:[#allocation54_spill] sm:$0xff]  ;;  %v4064_v13 = vld [vmem:[#allocation32_spill] sm:$0xff] }
 0x2ea   : > { %1066 = vmatpush1.bf16.msra.mxu1 %v1031_v41  ;;  %1190 = vmatpush1.bf16.msra.mxu0 %v1159_v49  ;;  %v3484_v17 = vpop.permute.xlu1 %1792  ;;  %v3492_v57 = vpop.permute.xlu0 %1918  ;;  %v1298_v52 = vsel %vm1288_vm5, %v4045_v26, %v4044_v44 }
 0x2eb   : > { %1067 = vmatprep.subr.bf16.mxu1 %v1030_v60  ;;  %1191 = vmatprep.subr.bf16.mxu0 %v1158_v35  ;;  %v4048_v60 = vld [vmem:[#allocation50_spill] sm:$0xff] }
 0x2ec   : > { %2013 = vperm.xlu1 %2293, %v2010_v37   ;;  %2021 = vperm.xlu0 %2292, %v2018_v0   ;;  %v4043_v37 = vld [vmem:[#allocation76_spill] sm:$0xff]  ;;  %v4047_v0 = vld [vmem:[#allocation67_spill] sm:$0xff]  ;;  %v1297_v35 = vsel %vm1288_vm5, %v4048_v60, %v4045_v26 }
 0x2ed   : > { %v1428_v41 = vsel %vm1416_vm6, %v4047_v0, %v4046_v7  ;;  %v4068_v26 = vld [vmem:[#allocation11_spill] sm:$0xff] }
 0x2ee   : > { %1068 = vmatpush1.bf16.msra.mxu1 %v1029_v20  ;;  %1192 = vmatpush1.bf16.msra.mxu0 %v1157_v32  ;;  %v1789_v28 = vpop.permute.xlu1 %1788  ;;  %v1791_v1 = vpop.permute.xlu0 %1790  ;;  %v4049_v20 = vld [vmem:[#allocation61_spill] sm:$0xff] }
 0x2ef   : > { %1069 = vmatprep.subr.bf16.mxu1 %v1028_v51  ;;  %1193 = vmatprep.subr.bf16.mxu0 %v1156_v4  ;;  %v3510_v19 = vsel %vm1798_vm10, %v1789_v28, %v1791_v1  ;;  %v1427_v32 = vsel %vm1416_vm6, %v4049_v20, %v4047_v0  ;;  %v4051_v51 = vld [vmem:[#allocation42_spill] sm:$0xff]  ;;  %v4052_v1 = vld [vmem:[#allocation56_spill] sm:$0xff] }
 0x2f0   : > { %2046 = vperm.xlu1 %2293, %v2043_v50   ;;  %v4070_v0 = vld [vmem:[#allocation20_spill] sm:$0xff] }
 0x2f1   : > { %v4072_v20 = vld [vmem:[#allocation8_spill] sm:$0xff] }
 0x2f2   : > { %1070 = vmatpush1.bf16.msra.mxu1 %v1027_v62  ;;  %1194 = vmatpush1.bf16.msra.mxu0 %v1155_v5  ;;  %v1787_v38 = vpop.permute.xlu1 %1786  ;;  %v1287_v53 = vpop.permute.xlu0 %1286  ;;  %v4053_v62 = vld [vmem:[#allocation55_spill] sm:$0xff] }
 0x2f3   : > { %v3525_v58 = vsel %vm1798_vm10, %v1787_v38, %v1789_v28  ;;  %1071 = vmatprep.subr.bf16.mxu1 %v1026_v45  ;;  %1195 = vmatprep.subr.bf16.mxu0 %v1154_v59  ;;  %v4050_v28 = vld [vmem:[#allocation41_spill] sm:$0xff]  ;;  %v1426_v5 = vsel %vm1416_vm6, %v4053_v62, %v4052_v1  ;;  %v4054_v45 = vld [vmem:[#allocation38_spill] sm:$0xff]  ;;  %v4074_v1 = vld [vmem:[#allocation12_spill] sm:$0xff] }
 0x2f4   : > { %v1296_v4 = vsel %vm1288_vm5, %v4051_v51, %v4050_v28  ;;  %v1295_v59 = vsel %vm1288_vm5, %v4054_v45, %v4051_v51  ;;  %v4073_v28 = vld [vmem:[#allocation15_spill] sm:$0xff] }
 0x2f6   : > { %1072 = vmatpush1.bf16.msra.mxu1 %v1025_v46  ;;  %1196 = vmatpush1.bf16.msra.mxu0 %v1153_v29  ;;  %v1285_v21 = vpop.permute.xlu1 %1284  ;;  %v1413_v48 = vpop.permute.xlu0 %1412 }
 0x2f7   : > { %v1303_v24 = vsel %vm1288_vm5, %v3386_v30, %v1285_v21  ;;  %1197 = vmatprep.subr.bf16.mxu0 %v1152_v34  ;;  %v1304_v39 = vsel %vm1288_vm5, %v1285_v21, %v1287_v53  ;;  %v2226_v30 = vld [vmem:[%s3924_s4 + $0x8] sm:$0xf]  ;;  %v1431_v18 = vsel %vm1416_vm6, %v3380_v54, %v1413_v48  ;;  %v4055_v53 = vld [vmem:[#allocation49_spill] sm:$0xff]  ;;  %v4057_v34 = vld [vmem:[#allocation30_spill] sm:$0xff] }
 0x2f8   : > { %1321 = vmatprep.subr.bf16.mxu1 %v1304_v39  ;;  %v1425_v46 = vsel %vm1416_vm6, %v4055_v53, %v4053_v62  ;;  %v4056_v21 = vld [vmem:[#allocation29_spill] sm:$0xff] }
 0x2f9   : > { %1090 = vmatmul.mubr.bf16.vlgmr.msra.gmra.mxu1 %v2225_v61  ;;  %v4058_v61 = vld [vmem:[#allocation44_spill] sm:$0xff]  ;;  %v4075_v62 = vld [vmem:[#allocation13_spill] sm:$0xff] }
 0x2fa   : > { %1198 = vmatpush1.bf16.msra.mxu0 %v1151_v40  ;;  %1322 = vmatpush1.bf16.msra.mxu1 %v1303_v24  ;;  %v1415_v22 = vpop.permute.xlu1 %1414  ;;  %v3548_v3 = vpop.permute.xlu0 %1914  ;;  %v4059_v24 = vld [vmem:[#allocation43_spill] sm:$0xff] }
 0x2fb   : > { %1323 = vmatprep.subr.bf16.mxu1 %v1302_v47  ;;  %v1432_v25 = vsel %vm1416_vm6, %v1413_v48, %v1415_v22  ;;  %1353 = vmatprep.mubr.bf16.mxu1 %v4037_v27  ;;  %v1294_v48 = vsel %vm1288_vm5, %v4057_v34, %v4056_v21  ;;  %v1424_v39 = vsel %vm1416_vm6, %v4059_v24, %v4058_v61  ;;  %v4060_v22 = vld [vmem:[#allocation26_spill] sm:$0xff]  ;;  %v4061_v47 = vld [vmem:[#allocation37_spill] sm:$0xff]  ;;  %v3662_v21 = vpop.f32.mrf.mxu1 }
 0x2fc   : > { %1449 = vmatprep.subr.bf16.mxu0 %v1432_v25  ;;  %v1293_v36 = vsel %vm1288_vm5, %v4060_v22, %v4057_v34  ;;  %v4076_v34 = vld [vmem:[#allocation9_spill] sm:$0xff] }
 0x2fd   : > { %1216 = vmatmul.mubr.bf16.vlgmr.msra.gmra.mxu0 %v2226_v30  ;;  %v1423_v30 = vsel %vm1416_vm6, %v4061_v47, %v4059_v24  ;;  %v3667_v61 = vpop.f32.mrf.mxu1 }
 0x2fe   : > { %1324 = vmatpush1.bf16.msra.mxu1 %v4038_v23  ;;  %1450 = vmatpush1.bf16.msra.mxu0 %v1431_v18  ;;  %v3558_v42 = vpop.permute.xlu1 %1916  ;;  %v1913_v2 = vpop.permute.xlu0 %1912  ;;  %v4062_v18 = vld [vmem:[#allocation17_spill] sm:$0xff]  ;;  %v4063_v23 = vld [vmem:[#allocation18_spill] sm:$0xff] }
 0x2ff   : > { %1325 = vmatprep.subr.bf16.mxu1 %v1300_v16  ;;  %1451 = vmatprep.subr.bf16.mxu0 %v1430_v33  ;;  %v3568_v54 = vsel %vm1924_vm11, %v1913_v2, %v3548_v3  ;;  %v1292_v11 = vsel %vm1288_vm5, %v4063_v23, %v4062_v18  ;;  %v4065_v16 = vld [vmem:[#allocation31_spill] sm:$0xff]  ;;  %v4066_v2 = vld [vmem:[#allocation14_spill] sm:$0xff]  ;;  %v4077_v18 = vld [vmem:[#allocation77_spill] sm:$0xff] }
 0x300   : > { %1481 = vmatprep.mubr.bf16.mxu0 %v4037_v27  ;;  %v1422_v55 = vsel %vm1416_vm6, %v4065_v16, %v4064_v13  ;;  %v1291_v63 = vsel %vm1288_vm5, %v4066_v2, %v4063_v23  ;;  %v4079_v13 = vld [vmem:[#allocation70_spill] sm:$0xff]  ;;  %v4081_v2 = vld [vmem:[#allocation64_spill] sm:$0xff] }
 0x302   : > { %1326 = vmatpush1.bf16.msra.mxu1 %v1299_v10  ;;  %1452 = vmatpush1.bf16.msra.mxu0 %v4043_v37  ;;  %v3575_v56 = vpop.permute.xlu1 %1782  ;;  %v3583_v49 = vpop.permute.xlu0 %1784  ;;  %v4067_v10 = vld [vmem:[#allocation25_spill] sm:$0xff] }
 0x303   : > { %1327 = vmatprep.subr.bf16.mxu1 %v1298_v52  ;;  %1453 = vmatprep.subr.bf16.mxu0 %v1428_v41  ;;  %v1421_v37 = vsel %vm1416_vm6, %v4067_v10, %v4065_v16  ;;  %v4069_v52 = vld [vmem:[#allocation10_spill] sm:$0xff]  ;;  %v4071_v41 = vld [vmem:[#allocation19_spill] sm:$0xff] }
 0x304   : > { %v1290_v7 = vsel %vm1288_vm5, %v4069_v52, %v4068_v26  ;;  %v1420_v60 = vsel %vm1416_vm6, %v4071_v41, %v4070_v0  ;;  %v1419_v51 = vsel %vm1416_vm6, %v4073_v28, %v4071_v41  ;;  %v4084_v26 = vld [vmem:[#allocation58_spill] sm:$0xff]  ;;  %v4085_v0 = vld [vmem:[#allocation72_spill] sm:$0xff]  ;;  %v4086_v41 = vld [vmem:[#allocation71_spill] sm:$0xff] }
 0x306   : > { %1328 = vmatpush1.bf16.msra.mxu1 %v1297_v35  ;;  %1454 = vmatpush1.bf16.msra.mxu0 %v1427_v32  ;;  %v3591_v50 = vpop.permute.xlu1 %1780  ;;  %v3599_v38 = vpop.permute.xlu0 %1908  ;;  %v1289_v32 = vsel %vm1288_vm5, %v4072_v20, %v4069_v52  ;;  %v4088_v20 = vld [vmem:[#allocation52_spill] sm:$0xff] }
 0x307   : > { %1329 = vmatprep.subr.bf16.mxu1 %v1296_v4  ;;  %1455 = vmatprep.subr.bf16.mxu0 %v1426_v5  ;;  %v1418_v5 = vsel %vm1416_vm6, %v4075_v62, %v4074_v1 }
 0x30a   : > { %1330 = vmatpush1.bf16.msra.mxu1 %v1295_v59  ;;  %1456 = vmatpush1.bf16.msra.mxu0 %v1425_v46  ;;  %v3607_v29 = vpop.permute.xlu1 %1910  ;;  %v3615_v40 = vpop.permute.xlu0 %1906  ;;  %v2227_v59 = vld [vmem:[%s3924_s4 + $0xc] sm:$0xf] }
 0x30b   : > { %1331 = vmatprep.subr.bf16.mxu1 %v1294_v48  ;;  %1457 = vmatprep.subr.bf16.mxu0 %v1424_v39  ;;  %v1417_v48 = vsel %vm1416_vm6, %v4076_v34, %v4075_v62  ;;  %v4091_v62 = vld [vmem:[#allocation60_spill] sm:$0xff]  ;;  %v4094_v34 = vld [vmem:[#allocation51_spill] sm:$0xff] }
 0x30e   : > { %1332 = vmatpush1.bf16.msra.mxu1 %v1293_v36  ;;  %1458 = vmatpush1.bf16.msra.mxu0 %v1423_v30  ;;  %v3623_v25 = vpop.permute.xlu1 %1776  ;;  %v3631_v33 = vpop.permute.xlu0 %1778 }
 0x30f   : > { %1333 = vmatprep.subr.bf16.mxu1 %v1292_v11  ;;  %1459 = vmatprep.subr.bf16.mxu0 %v1422_v55  ;;  %v941_v36 = vpop.f32.mrf.mxu1  ;;  %v4078_v11 = vld [vmem:[#allocation69_spill] sm:$0xff]  ;;  %v4080_v55 = vld [vmem:[#allocation79_spill] sm:$0xff] }
 0x311   : > { %v942_v30 = vpop.f32.mrf.mxu1 }
 0x312   : > { %1334 = vmatpush1.bf16.msra.mxu1 %v1291_v63  ;;  %1460 = vmatpush1.bf16.msra.mxu0 %v1421_v37  ;;  %v3639_v44 = vpop.permute.xlu1 %1774  ;;  %v1541_v35 = vpop.permute.xlu0 %1540  ;;  %v4082_v63 = vld [vmem:[#allocation78_spill] sm:$0xff]  ;;  %v4083_v37 = vld [vmem:[#allocation57_spill] sm:$0xff]  ;;  %v4098_v30 = vld [vmem:[#allocation47_spill] sm:$0xff] }
 0x313   : > { %1335 = vmatprep.subr.bf16.mxu1 %v1290_v7  ;;  %1461 = vmatprep.subr.bf16.mxu0 %v1420_v60  ;;  %v1552_v52 = vsel %vm1542_vm7, %v4084_v26, %v4083_v37  ;;  %v4087_v60 = vld [vmem:[#allocation63_spill] sm:$0xff]  ;;  %v4102_v37 = vld [vmem:[#allocation22_spill] sm:$0xff] }
 0x316   : > { %1336 = vmatpush1.bf16.msra.mxu1 %v1289_v32  ;;  %1462 = vmatpush1.bf16.msra.mxu0 %v1419_v51  ;;  %v1539_v4 = vpop.permute.xlu1 %1538  ;;  %v1667_v45 = vpop.permute.xlu0 %1666  ;;  %v1551_v32 = vsel %vm1542_vm7, %v4088_v20, %v4084_v26  ;;  %v4089_v51 = vld [vmem:[#allocation45_spill] sm:$0xff] }
 0x317   : > { %v1557_v53 = vsel %vm1542_vm7, %v3394_v14, %v1539_v4  ;;  %1463 = vmatprep.subr.bf16.mxu0 %v1418_v5  ;;  %v1558_v46 = vsel %vm1542_vm7, %v1539_v4, %v1541_v35  ;;  %v2228_v14 = vld [vmem:[%s3924_s4 + $0x10] sm:$0xf]  ;;  %v1685_v47 = vsel %vm1670_vm4, %v3388_v31, %v1667_v45  ;;  %v1553_v31 = vsel %vm1542_vm7, %v4081_v2, %v4079_v13  ;;  %v4090_v4 = vld [vmem:[#allocation46_spill] sm:$0xff]  ;;  %v4092_v5 = vld [vmem:[#allocation59_spill] sm:$0xff] }
 0x318   : > { %1575 = vmatprep.subr.bf16.mxu1 %v1558_v46  ;;  %v1681_v35 = vsel %vm1670_vm4, %v4087_v60, %v4086_v41  ;;  %v1550_v1 = vsel %vm1542_vm7, %v4090_v4, %v4089_v51 }
 0x319   : > { %1354 = vmatmul.mubr.bf16.vlgmr.msra.gmra.mxu1 %v2227_v59 }
 0x31a   : > { %1464 = vmatpush1.bf16.msra.mxu0 %v1417_v48  ;;  %1576 = vmatpush1.bf16.msra.mxu1 %v1557_v53  ;;  %v1669_v24 = vpop.permute.xlu1 %1668  ;;  %v3669_v39 = vpop.permute.xlu0 %1902  ;;  %v4093_v53 = vld [vmem:[#allocation40_spill] sm:$0xff]  ;;  %v1679_v48 = vsel %vm1670_vm4, %v4094_v34, %v4092_v5 }
 0x31b   : > { %1577 = vmatprep.subr.bf16.mxu1 %v3367_v15  ;;  %v1686_v22 = vsel %vm1670_vm4, %v1667_v45, %v1669_v24  ;;  %1607 = vmatprep.mubr.bf16.mxu1 %v4037_v27  ;;  %v1554_v15 = vsel %vm1542_vm7, %v4079_v13, %v4078_v11  ;;  %v1680_v45 = vsel %vm1670_vm4, %v4092_v5, %v4091_v62  ;;  %v4099_v13 = vld [vmem:[#allocation28_spill] sm:$0xff]  ;;  %v4108_v62 = vld [vmem:[#allocation23_spill] sm:$0xff] }
 0x31c   : > { %1703 = vmatprep.subr.bf16.mxu0 %v1686_v22  ;;  %v1549_v46 = vsel %vm1542_vm7, %v4093_v53, %v4090_v4  ;;  %v4096_v22 = vld [vmem:[#allocation34_spill] sm:$0xff]  ;;  %v1673_v53 = vsel %vm1670_vm4, %v3408_v9, %v4108_v62 }
 0x31d   : > { %1482 = vmatmul.mubr.bf16.vlgmr.msra.gmra.mxu0 %v2228_v14  ;;  %v4095_v14 = vld [vmem:[#allocation33_spill] sm:$0xff] }
 0x31e   : > { %1578 = vmatpush1.bf16.msra.mxu1 %v4077_v18  ;;  %1704 = vmatpush1.bf16.msra.mxu0 %v1685_v47  ;;  %v3680_v23 = vpop.permute.xlu1 %1904  ;;  %v1797_v16 = vpop.permute.xlu0 %1796  ;;  %v1548_v36 = vsel %vm1542_vm7, %v4096_v22, %v4095_v14  ;;  %v4097_v47 = vld [vmem:[#allocation48_spill] sm:$0xff]  ;;  %v2229_v14 = vld [vmem:[%s3924_s4 + $0x14] sm:$0xf] }
 0x31f   : > { %1579 = vmatprep.subr.bf16.mxu1 %v1554_v15  ;;  %1705 = vmatprep.subr.bf16.mxu0 %v4080_v55  ;;  %v1678_v18 = vsel %vm1670_vm4, %v4098_v30, %v4097_v47  ;;  %v1547_v15 = vsel %vm1542_vm7, %v4099_v13, %v4096_v22  ;;  %v4100_v55 = vld [vmem:[#allocation39_spill] sm:$0xff]  ;;  %v2230_v22 = vld [vmem:[%s3924_s4 + $0x18] sm:$0xf] }
 0x320   : > { %1735 = vmatprep.mubr.bf16.mxu0 %v4037_v27  ;;  %v1677_v2 = vsel %vm1670_vm4, %v4100_v55, %v4098_v30 }
 0x322   : > { %1580 = vmatpush1.bf16.msra.mxu1 %v1553_v31  ;;  %1706 = vmatpush1.bf16.msra.mxu0 %v4082_v63  ;;  %v1795_v10 = vpop.permute.xlu1 %1794  ;;  %v3694_v7 = vpop.permute.xlu0 %1920  ;;  %v4101_v63 = vld [vmem:[#allocation21_spill] sm:$0xff] }
 0x323   : > { %1581 = vmatprep.subr.bf16.mxu1 %v1552_v52  ;;  %1707 = vmatprep.subr.bf16.mxu0 %v4085_v0  ;;  %v1546_v26 = vsel %vm1542_vm7, %v4102_v37, %v4101_v63  ;;  %v4103_v52 = vld [vmem:[#allocation36_spill] sm:$0xff]  ;;  %v4104_v0 = vld [vmem:[#allocation35_spill] sm:$0xff]  ;;  %v1814_v34 = vsel %vm1798_vm10, %v1795_v10, %v1797_v16 }
 0x324   : > { %v1676_v41 = vsel %vm1670_vm4, %v4104_v0, %v4103_v52 }
 0x326   : > { %1582 = vmatpush1.bf16.msra.mxu1 %v1551_v32  ;;  %1708 = vmatpush1.bf16.msra.mxu0 %v1681_v35  ;;  %v1923_v28 = vpop.permute.xlu1 %1922  ;;  %v3709_v59 = vpop.permute.xlu0 %1900  ;;  %v4105_v35 = vld [vmem:[#allocation16_spill] sm:$0xff]  ;;  %v4106_v32 = vld [vmem:[#allocation27_spill] sm:$0xff] }
 0x327   : > { %1583 = vmatprep.subr.bf16.mxu1 %v1550_v1  ;;  %1709 = vmatprep.subr.bf16.mxu0 %v1680_v45  ;;  %v1545_v20 = vsel %vm1542_vm7, %v4105_v35, %v4102_v37  ;;  %v1675_v51 = vsel %vm1670_vm4, %v4106_v32, %v4104_v0  ;;  %v4107_v1 = vld [vmem:[#allocation24_spill] sm:$0xff] }
 0x328   : > { %v1674_v5 = vsel %vm1670_vm4, %v4108_v62, %v4107_v1 }
 0x32a   : > { %1584 = vmatpush1.bf16.msra.mxu1 %v1549_v46  ;;  %1710 = vmatpush1.bf16.msra.mxu0 %v1679_v48  ;;  %v3717_v24 = vpop.permute.xlu1 %1770  ;;  %v3725_v11 = vpop.permute.xlu0 %1772 }
 0x32b   : > { %1585 = vmatprep.subr.bf16.mxu1 %v1548_v36  ;;  %1711 = vmatprep.subr.bf16.mxu0 %v1678_v18 }
 0x32e   : > { %1586 = vmatpush1.bf16.msra.mxu1 %v1547_v15  ;;  %1712 = vmatpush1.bf16.msra.mxu0 %v1677_v2  ;;  %v3733_v31 = vpop.permute.xlu1 %1768  ;;  %v3741_v60 = vpop.permute.xlu0 %1896 }
 0x32f   : > { %1587 = vmatprep.subr.bf16.mxu1 %v1546_v26  ;;  %1713 = vmatprep.subr.bf16.mxu0 %v1676_v41  ;;  %v2231_v26 = vld [vmem:[%s3924_s4 + $0x1c] sm:$0xf]  ;;  %v2232_v41 = vld [vmem:[%s3924_s4 + $0x20] sm:$0xf] }
 0x332   : > { %1588 = vmatpush1.bf16.msra.mxu1 %v1545_v20  ;;  %1714 = vmatpush1.bf16.msra.mxu0 %v1675_v51  ;;  %v1899_v4 = vpop.permute.xlu1 %1898  ;;  %v3752_v45 = vpop.permute.xlu0 %1894 }
 0x333   : > { %1589 = vmatprep.subr.bf16.mxu1 %v3426_v6  ;;  %1715 = vmatprep.subr.bf16.mxu0 %v1674_v5  ;;  %v1813_v6 = vsel %vm1798_vm10, %v3484_v17, %v1795_v10  ;;  %v1810_v17 = vsel %vm1798_vm10, %v3575_v56, %v3583_v49  ;;  %v1808_v49 = vsel %vm1798_vm10, %v3623_v25, %v3631_v33 }
 0x336   : > { %1590 = vmatpush1.bf16.msra.mxu1 %v3445_v12  ;;  %1716 = vmatpush1.bf16.msra.mxu0 %v1673_v53  ;;  %v1765_v46 = vpop.permute.xlu1 %1764  ;;  %v1767_v48 = vpop.permute.xlu0 %1766  ;;  %v1940_v12 = vsel %vm1924_vm11, %v3694_v7, %v1923_v28  ;;  %v1931_v28 = vsel %vm1924_vm11, %v3752_v45, %v3741_v60 }
 0x337   : > { %1717 = vmatprep.subr.bf16.mxu0 %v3476_v43  ;;  %1831 = vmatprep.subr.bf16.mxu1 %v1814_v34  ;;  %v1939_v43 = vsel %vm1924_vm11, %v3492_v57, %v3694_v7  ;;  %v1809_v57 = vsel %vm1798_vm10, %v3591_v50, %v3575_v56  ;;  %v1806_v50 = vsel %vm1798_vm10, %v3717_v24, %v3725_v11 }
 0x338   : > { %v1932_v7 = vsel %vm1924_vm11, %v3741_v60, %v1899_v4  ;;  %v875_v60 = vlaneseq }
 0x339   : > { %1608 = vmatmul.mubr.bf16.vlgmr.msra.gmra.mxu1 %v2229_v14 }
 0x33a   : > { %1718 = vmatpush1.bf16.msra.mxu0 %v3473_v8  ;;  %1832 = vmatpush1.bf16.msra.mxu1 %v1813_v6  ;;  %v1763_v9 = vpop.permute.xlu1 %1762  ;;  %v1891_v16 = vpop.permute.xlu0 %1890  ;;  %v876_v35 = vand.u32 127, %v875_v60 }
 0x33b   : > { %1833 = vmatprep.subr.bf16.mxu1 %v3510_v19  ;;  %1957 = vmatprep.subr.bf16.mxu0 %v1940_v12  ;;  %v1938_v19 = vsel %vm1924_vm11, %v3548_v3, %v3558_v42  ;;  %v1936_v3 = vsel %vm1924_vm11, %v3599_v38, %v3607_v29  ;;  %v1934_v29 = vsel %vm1924_vm11, %v3669_v39, %v3680_v23 }
 0x33c   : > { %1863 = vmatprep.mubr.bf16.mxu1 %v4037_v27  ;;  %v877_v20 = vadd.s32 128, %v876_v35  ;;  %v882_v32 = vand.u32 15, %v876_v35 }
 0x33d   : > { %1736 = vmatmul.mubr.bf16.vlgmr.msra.gmra.mxu0 %v2230_v22 }
 0x33e   : > { %1834 = vmatpush1.bf16.msra.mxu1 %v3525_v58  ;;  %1958 = vmatpush1.bf16.msra.mxu0 %v1939_v43  ;;  %v1893_v8 = vpop.permute.xlu1 %1892  ;;  %v1889_v10 = vpop.permute.xlu0 %1888  ;;  %v889_v51 = vand.u32 15, %v877_v20  ;;  %vm3836_vm12 = vcmp.ge.s32.totalorder %v882_v32, 1  ;;  %vm3850_vm14 = vcmp.lt.s32.totalorder %v882_v32, 15 }
 0x33f   : > { %1835 = vmatprep.subr.bf16.mxu1 %v1810_v17  ;;  %1959 = vmatprep.subr.bf16.mxu0 %v1938_v19  ;;  %v1930_v36 = vsel %vm1924_vm11, %v1891_v16, %v1893_v8  ;;  %v1929_v30 = vsel %vm1924_vm11, %v1889_v10, %v1891_v16  ;;  %v954_v62 = vsel %vm3836_vm12, %v3662_v21, 0.0 }
 0x340   : > { %1989 = vmatprep.mubr.bf16.mxu0 %v4037_v27  ;;  %v1935_v27 = vsel %vm1924_vm11, %v3615_v40, %v3599_v38  ;;  %v1933_v38 = vsel %vm1924_vm11, %v3709_v59, %v3669_v39  ;;  %v1805_v40 = vsel %vm1798_vm10, %v3733_v31, %v3717_v24  ;;  %v1803_v39 = vsel %vm1798_vm10, %v1763_v9, %v1765_v46 }
 0x341   : > { %vm3840_vm13 = vcmp.ge.s32.totalorder %v889_v51, 1  ;;  %vm3854_vm15 = vcmp.lt.s32.totalorder %v889_v51, 15 }
 0x342   : > { %1836 = vmatpush1.bf16.msra.mxu1 %v1809_v57  ;;  %1960 = vmatpush1.bf16.msra.mxu0 %v3568_v54  ;;  %v1759_v58 = vpop.permute.xlu1 %1758  ;;  %v1761_v42 = vpop.permute.xlu0 %1760  ;;  %v1807_v54 = vsel %vm1798_vm10, %v3639_v44, %v3623_v25  ;;  %v1804_v44 = vsel %vm1798_vm10, %v1765_v46, %v1767_v48  ;;  %v955_v53 = vsel %vm3840_vm13, %v3667_v61, 0.0  ;;  %v4119_v46 = vld [vmem:[#allocation6_spill] sm:$0xff] }
 0x343   : > { %1837 = vmatprep.subr.bf16.mxu1 %v1808_v49  ;;  %1961 = vmatprep.subr.bf16.mxu0 %v1936_v3  ;;  %v1802_v24 = vsel %vm1798_vm10, %v1759_v58, %v1761_v42 }
 0x346   : > { %1838 = vmatpush1.bf16.msra.mxu1 %v1807_v54  ;;  %1962 = vmatpush1.bf16.msra.mxu0 %v1935_v27  ;;  %v1757_v56 = vpop.permute.xlu1 %1756  ;;  %v1885_v33 = vpop.permute.xlu0 %1884 }
 0x347   : > { %1839 = vmatprep.subr.bf16.mxu1 %v1806_v50  ;;  %1963 = vmatprep.subr.bf16.mxu0 %v1934_v29  ;;  %v1801_v18 = vsel %vm1798_vm10, %v1757_v56, %v1759_v58 }
 0x34a   : > { %1840 = vmatpush1.bf16.msra.mxu1 %v1805_v40  ;;  %1964 = vmatpush1.bf16.msra.mxu0 %v1933_v38  ;;  %v1887_v25 = vpop.permute.xlu1 %1886  ;;  %v1883_v23 = vpop.permute.xlu0 %1882 }
 0x34b   : > { %1841 = vmatprep.subr.bf16.mxu1 %v1804_v44  ;;  %1965 = vmatprep.subr.bf16.mxu0 %v1932_v7  ;;  %v1928_v15 = vsel %vm1924_vm11, %v1885_v33, %v1887_v25  ;;  %v1927_v31 = vsel %vm1924_vm11, %v1883_v23, %v1885_v33 }
 0x34e   : > { %1842 = vmatpush1.bf16.msra.mxu1 %v1803_v39  ;;  %1966 = vmatpush1.bf16.msra.mxu0 %v1931_v28  ;;  %v1753_v59 = vpop.permute.xlu1 %1752  ;;  %v1755_v47 = vpop.permute.xlu0 %1754  ;;  %v2383_v28 = vmov 839922192  }
 0x34f   : > { %1843 = vmatprep.subr.bf16.mxu1 %v1802_v24  ;;  %1967 = vmatprep.subr.bf16.mxu0 %v1930_v36  ;;  %v1800_v13 = vsel %vm1798_vm10, %v1753_v59, %v1755_v47  ;;  %v2035_v39 = vunpack.c.l.s4 %v2383_v28 }
 0x351   : > { %v2036_v47 = vunpack.c.0.s8 %v2035_v39 }
 0x352   : > { %1844 = vmatpush1.bf16.msra.mxu1 %v1801_v18  ;;  %1968 = vmatpush1.bf16.msra.mxu0 %v1929_v30  ;;  %v1751_v11 = vpop.permute.xlu1 %1750  ;;  %v1879_v55 = vpop.permute.xlu0 %1878  ;;  %v2038_v30 = vshrl.u32 %v875_v60, 7 }
 0x353   : > { %v1799_v2 = vsel %vm1798_vm10, %v1751_v11, %v1753_v59  ;;  %1845 = vmatprep.subr.bf16.mxu1 %v1800_v13  ;;  %1969 = vmatprep.subr.bf16.mxu0 %v1928_v15 }
 0x356   : > { %1846 = vmatpush1.bf16.msra.mxu1 %v1799_v2  ;;  %1970 = vmatpush1.bf16.msra.mxu0 %v1927_v31  ;;  %v1881_v63 = vpop.permute.xlu1 %1880  ;;  %v1877_v37 = vpop.permute.xlu0 %1876 }
 0x357   : > { %v1925_v52 = vsel %vm1924_vm11, %v1877_v37, %v1879_v55  ;;  %v1926_v0 = vsel %vm1924_vm11, %v1879_v55, %v1881_v63  ;;  %v2039_v37 = vsub.s32 %v2036_v47, %v2038_v30 }
 0x358   : > { %1971 = vmatprep.subr.bf16.mxu0 %v1926_v0 }
 0x359   : > { %1864 = vmatmul.mubr.bf16.vlgmr.msra.gmra.mxu1 %v2231_v26 }
 0x35a   : > { %1972 = vmatpush1.bf16.msra.mxu0 %v1925_v52 }
 0x35d   : > { %1990 = vmatmul.mubr.bf16.vlgmr.msra.gmra.mxu0 %v2232_v41 }
 0x363   : > { %v2006_v7 = vpop.permute.xlu1 %2005  ;;  %v2033_v41 = vpop.permute.xlu0 %2032 }
 0x367   : > { %v2014_v11 = vpop.permute.xlu1 %2013 }
 0x36b   : > { %v2047_v51 = vpop.permute.xlu1 %2046 }
 0x3b9   : > { %v1091_v5 = vpop.f32.mrf.mxu1 }
 0x3ba   : > { %v1098_v45 = vadd.f32 %v1091_v5, %v954_v62  ;;  %v2040_v62 = vrot.slane %v2033_v41, %v2039_v37 }
 0x3bb   : > { %v1093_v34 = vpop.f32.mrf.mxu1 }
 0x3bc   : > { %v1099_v48 = vadd.f32 %v1093_v34, %v955_v53  ;;  %v2028_v34 = vld [vmem:[%s365_s27] sm:$0xff]  ;;  %s2315_s27 = sshll.u32 %s2384_s26, 4  ;;  %s2316_s27 = int_to_ptr.vmem [resolvable:$false] %s2315_s27 }
 0x3bd   : > { %v1217_v14 = vpop.f32.mrf.mxu0  ;;  %v1095_v9 = vpop.f32.mrf.mxu1  ;;  %s2317_s13 = scalar_lea.vmem %s2316_s27, 256  ;;  %p2318_p0 = scmp.lt.s32.totalorder %s2093_s21, %s2316_s27 }
 0x3be   : > { %v1234_v21 = vsel %vm3850_vm14, %v1217_v14, 0.0  ;;  %v4117_v14 = vld [vmem:[#allocation7_spill] sm:$0xff]  ;;  %v4118_v9 = vld [vmem:[#allocation5_spill] sm:$0xff]  ;;  %p2319_p1 = scmp.lt.s32.totalorder %s2317_s13, %s2311_s16 }
 0x3bf   : > { %v1236_v12 = vadd.f32 %v1234_v21, %v1098_v45  ;;  %v1219_v16 = vpop.f32.mrf.mxu0  ;;  %v1096_v22 = vpop.f32.mrf.mxu1  ;;  %v714_v21 = vadd.f32 %v4118_v9, %v4117_v14 }
 0x3c0   : > { %v1235_v61 = vsel %vm3854_vm15, %v1219_v16, 0.0  ;;  %p2320_p2 = por %p2319_p1, %p2318_p0 }
 0x3c1   : > { %v1237_v43 = vadd.f32 %v1235_v61, %v1099_v48  ;;  %v1221_v8 = vpop.f32.mrf.mxu0 }
 0x3c2   : > { %v2022_v8 = vpop.permute.xlu0 %2021  ;;  %p2321_p3 = pnand %p2320_p2, %p2314_p13 }
 0x3c3   : > { %v1222_v17 = vpop.f32.mrf.mxu0 }
 0x3c4   : > { %v2042_v17 = vmul.f32 %v2040_v62, %v2028_v34 }
 0x3d9   : > { %v1355_v19 = vpop.f32.mrf.mxu1 }
 0x3da   : > { %v1362_v44 = vsel %vm3836_vm12, %v1355_v19, 0.0  ;;  %v2016_v19 = vmul.f32 %v2014_v11, %v714_v21 }
 0x3db   : > { %v1357_v10 = vpop.f32.mrf.mxu1  ;;  %v1364_v59 = vadd.f32 %v1362_v44, %v1236_v12  ;;  %v2054_v12 = vrot.slane %v2047_v51, %v2039_v37 }
 0x3dc   : > { %v1363_v23 = vsel %vm3840_vm13, %v1357_v10, 0.0 }
 0x3dd   : > { %v1483_v57 = vpop.f32.mrf.mxu0  ;;  %v1359_v58 = vpop.f32.mrf.mxu1  ;;  %v1365_v24 = vadd.f32 %v1363_v23, %v1237_v43  ;;  %v716_v43 = vadd.f32 %v4119_v46, %v4117_v14 }
 0x3de   : > { %v1490_v18 = vadd.f32 %v1483_v57, %v1364_v59 }
 0x3df   : > { %v1485_v49 = vpop.f32.mrf.mxu0  ;;  %v1360_v3 = vpop.f32.mrf.mxu1  ;;  %v2017_v6 = vmul.f32 %v2014_v11, %v716_v43 }
 0x3e0   : > { %v1491_v55 = vadd.f32 %v1485_v49, %v1365_v24  ;;  %v2056_v49 = vadd.f32 %v2054_v12, %v2042_v17 }
 0x3e1   : > { %v1487_v42 = vpop.f32.mrf.mxu0 }
 0x3e3   : > { %v1488_v27 = vpop.f32.mrf.mxu0 }
 0x3f9   : > { %v1609_v54 = vpop.f32.mrf.mxu1 }
 0x3fa   : > { %v1616_v36 = vsel %vm3850_vm14, %v1609_v54, 0.0 }
 0x3fb   : > { %v1611_v56 = vpop.f32.mrf.mxu1  ;;  %v1618_v2 = vadd.f32 %v1616_v36, %v1490_v18 }
 0x3fc   : > { %v1617_v13 = vsel %vm3854_vm15, %v1611_v56, 0.0  ;;  %v2060_v56 = vcombine.high %v2056_v49, %v2056_v49 }
 0x3fd   : > { %v1737_v50 = vpop.f32.mrf.mxu0  ;;  %v1613_v29 = vpop.f32.mrf.mxu1  ;;  %v1619_v26 = vadd.f32 %v1617_v13, %v1491_v55 }
 0x3fe   : > { %v1744_v15 = vsel %vm3836_vm12, %v1737_v50, 0.0 }
 0x3ff   : > { %v1739_v33 = vpop.f32.mrf.mxu0  ;;  %v1614_v38 = vpop.f32.mrf.mxu1  ;;  %v1746_v52 = vadd.f32 %v1744_v15, %v1618_v2 }
 0x400   : > { %v1745_v63 = vsel %vm3840_vm13, %v1739_v33, 0.0 }
 0x401   : > { %v1741_v40 = vpop.f32.mrf.mxu0  ;;  %v1747_v60 = vadd.f32 %v1745_v63, %v1619_v26 }
 0x403   : > { %v1742_v25 = vpop.f32.mrf.mxu0 }
 0x419   : > { %v1865_v31 = vpop.f32.mrf.mxu1 }
 0x41a   : > { %v1872_v35 = vadd.f32 %v1865_v31, %v1746_v52 }
 0x41b   : > { %v1867_v0 = vpop.f32.mrf.mxu1 }
 0x41c   : > { %v1873_v1 = vadd.f32 %v1867_v0, %v1747_v60 }
 0x41d   : > { %v1991_v20 = vpop.f32.mrf.mxu0  ;;  %v1869_v32 = vpop.f32.mrf.mxu1 }
 0x41e   : > { %v1998_v4 = vsel %vm3850_vm14, %v1991_v20, 0.0 }
 0x41f   : > { %v2000_v5 = vadd.f32 %v1998_v4, %v1872_v35  ;;  %v1993_v45 = vpop.f32.mrf.mxu0  ;;  %v1870_v53 = vpop.f32.mrf.mxu1 }
 0x420   : > { %v1999_v48 = vsel %vm3854_vm15, %v1993_v45, 0.0 }
 0x421   : > { %v2008_v16 = vadd.f32 %v2006_v7, %v2000_v5  ;;  %v2001_v22 = vadd.f32 %v1999_v48, %v1873_v1  ;;  %v1995_v61 = vpop.f32.mrf.mxu0 }
 0x423   : > { %v2024_v10 = vmul.f32 %v2022_v8, %v2008_v16  ;;  %v2009_v57 = vadd.f32 %v2006_v7, %v2001_v22  ;;  %v1996_v58 = vpop.f32.mrf.mxu0 }
 0x425   : > { %v2026_v3 = vadd.f32 %v2024_v10, %v2016_v19  ;;  %v2025_v42 = vmul.f32 %v2022_v8, %v2009_v57 }
 0x427   : > { %v2057_v27 = vadd.f32 1.0, %v2026_v3  ;;  %v2027_v54 = vadd.f32 %v2025_v42, %v2017_v6  ;;  %v2066_v38 = vrot.slane %v2026_v3, 4 }
 0x429   : > { %v2058_v50 = vadd.f32 1.0, %v2027_v54  ;;  %v2062_v29 = vmul.f32 %v2057_v27, %v2056_v49  ;;  %v2067_v40 = vrot.slane %v2027_v54, 4 }
 0x42b   : > { %v2063_v33 = vmul.f32 %v2060_v56, %v2058_v50  ;;  %v2070_v25 = vadd.f32 %v2066_v38, %v2062_v29 }
 0x42d   : > { %v2071_v44 = vadd.f32 %v2067_v40, %v2063_v33 }
 0x42f   : > { %v2074_v7 = vcombine.low %v2070_v25, %v2071_v44 }
 0x431   : > { %2076 = vst [vmem:[%s355_s28] sm:$0xff] %v2074_v7 }
 0x432   : > { %2324 = shalt.err (!%p2321_p3)
}
 0x433   : > { %s2325_s29 = scalar_lea.hbm %s2090_s22, 128  ;;  %s2329_s28 = scalar_lea.hbm %s3929_s9, 256 }
 0x434   : > { %p2326_p4 = scmp.ne.s32.totalorder %s2090_s22, %s2325_s29  ;;  %p2330_p9 = scmp.lt.s32.totalorder %s2090_s22, %s3929_s9 }
 0x435   : > { %p2331_p10 = scmp.lt.s32.totalorder %s2329_s28, %s2325_s29 }
 0x436   : > { %p2327_p7 = pnand %p2326_p4, %p2473_p5 }
 0x437   : > { %p2332_p11 = por %p2331_p10, %p2330_p9 }
 0x438   : > { %p2328_p8 = pneg %p2327_p7 }
 0x43a   : > { %p2333_p12 = pnand %p2332_p11, %p2328_p8 }
 0x43c   : > { %2336 = shalt.err (!%p2333_p12)
}
 0x43d   : > { %2242 = dma.vmem_to_hbm [thread:$0]  (%p2473_p5), %s2093_s21, 128, %s2090_s22, %s2078_s24  }
 0x43e PF: > { %p2248_p13 = scmp.ge.s32.totalorder %s2371_s12, 2  ;;  %s2104_s16 = sand.u32 1, %s2359_s30  }
 0x43f   : > { %s2105_s26 = scalar_lea.sflag [#allocation3], %s2104_s16 }
 0x440   : > { %p2245_p0 = pnand %p2248_p13, %p2477_p6 }
 0x442   : > { %p2246_p1 = pneg %p2245_p0 }
 0x444   : > { %2354 = dma.done.wait (%p2246_p1), %s2105_s26, 128  }
 0x445   : > { %2356 = vsyncadd (%p2246_p1), %s2105_s26, 4294967168  ;;  %p19_p2 = scmp.ge.s32.totalorder %s2460_s15, 4   ;;  %s4120_s30 = smov %s2363_s10 }
 0x446   : > { %s4121_s10 = smov %s2367_s11  ;;  %s4122_s11 = smov %s2471_s18 }
 0x447   : > { %s4123_s12 = smov %s2460_s15  ;;  %21 = sbr.rel (!%p19_p2) target bundleno = 3 (0x3), region = 105 }
 0x44c   :  { %2110 = vsyncpa [#allocation3], 1 }
 0x44d   :  { %2112 = vsyncpa [#allocation3 + $0x1], 1 }

</bundles_post_ra>
